<compile_context>
chip_gen: v6e
topology: v6e:2x2x1
jax: 0.10.0
libtpu: 0.0.40
codegen_flags: <defaults>
</compile_context>

<pallas_src>
import functools

import numpy as np

import jax
import jax.numpy as jnp
from jax.experimental import pallas as pl
from jax.experimental.pallas import tpu as pltpu

NUM_CLASSES = 5
CONV_OUT = 16               # backbone stem channels (FPN out_channels analogue)
REPR_SIZE = 128             # TwoMLPHead representation size (1024 in the real model)
ROI_RES = 7                 # box_roi_pool output resolution
POOL_HW = ROI_RES * ROI_RES  # 49
HEAD_OUT = 128              # lane-dense padded predictor output width (>= 5*NUM_CLASSES)
PAD_STRIDE = 128            # lane stride per channel in the flattened roi row
K_PATCH = 3 * 3 * 3         # im2col contraction size (kh*kw*cin)
assert 5 * NUM_CLASSES <= HEAD_OUT
assert POOL_HW <= PAD_STRIDE


# ----------------------------------------------------------------------------- kernel
def _fused_detector_kernel(pt_ref, wc_ref, bc_ref, pool_ref,
                           w6_ref, b6_ref, w7_ref, b7_ref, wp_ref, bp_ref,
                           out_ref, score_ref, roi_scr):
    """Per image: conv(as matmul)+hardswish -> 2x2 avg-pool -> fc6 -> fc7 -> predictor -> softmax.

    All intermediates stay in VMEM / vregs; lanes carry the spatial dim in the stem
    (196 / 49 wide) and the 128-wide feature dim in the head.
    """
    # ---- backbone stem: channels on sublanes, spatial positions on lanes -------------
    conv = jnp.dot(wc_ref[...], pt_ref[...],
                   preferred_element_type=jnp.float32)           # (C, OH*OW) = (16, 196)
    conv = conv + bc_ref[...]                                    # (C, 1) broadcast over lanes
    h = conv * jnp.clip(conv + 3.0, 0.0, 6.0) * (1.0 / 6.0)      # hardswish (VPU, 4 vregs)
    pooled = jnp.dot(h.astype(jnp.bfloat16), pool_ref[...],
                     preferred_element_type=jnp.float32)         # (C, PH*PW) = (16, 49)

    # ---- channel-major flatten into a lane-padded (1, C*128) row --------------------
    # Each channel occupies an aligned 128-lane chunk; fc6's weight rows were scattered
    # to the same padded layout host-side, so padding lanes contribute exactly zero.
    roi_scr[...] = jnp.zeros_like(roi_scr)
    for c in range(CONV_OUT):                                    # static unroll, aligned stores
        roi_scr[:, c * PAD_STRIDE:c * PAD_STRIDE + POOL_HW] = pooled[c:c + 1, :]
    roi = roi_scr[...].astype(jnp.bfloat16)                      # (1, C*128)

    # ---- box head: fc6+ReLU -> fc7+ReLU -> fused [cls|bbox|pad] predictor ----------
    h6 = jnp.dot(roi, w6_ref[...], preferred_element_type=jnp.float32) + b6_ref[...]
    h6 = jnp.maximum(h6, 0.0)                                    # (1, 128)
    h7 = jnp.dot(h6.astype(jnp.bfloat16), w7_ref[...],
                 preferred_element_type=jnp.float32) + b7_ref[...]
    h7 = jnp.maximum(h7, 0.0)                                    # (1, 128)
    fused = jnp.dot(h7.astype(jnp.bfloat16), wp_ref[...],
                    preferred_element_type=jnp.float32) + bp_ref[...]
    out_ref[...] = fused                                         # cols [0:5]=cls, [5:25]=bbox

    # ---- eval-time class softmax over the first NUM_CLASSES lanes -------------------
    lane = jax.lax.broadcasted_iota(jnp.int32, fused.shape, 1)
    logits = jnp.where(lane < NUM_CLASSES, fused, jnp.float32(-1e30))
    mx = jnp.max(logits, axis=-1, keepdims=True)
    e = jnp.exp(logits - mx)                                     # padded lanes underflow to 0
    score_ref[...] = e / jnp.sum(e, axis=-1, keepdims=True)      # exact reciprocal (cheap here)


# ----------------------------------------------------------------------------- wrapper
def pallas_fused_detector(patches_t, prep):
    """patches_t: (N, K_PATCH, OH*OW) bf16. Returns (fused(N,1,128), scores(N,1,128))."""
    n, kdim, hw = patches_t.shape
    return pl.pallas_call(
        _fused_detector_kernel,
        grid=(n,),
        in_specs=[
            pl.BlockSpec((None, kdim, hw), lambda i: (i, 0, 0)),          # per-image patches
            pl.BlockSpec((CONV_OUT, kdim), lambda i: (0, 0)),             # conv weight^T (resident)
            pl.BlockSpec((CONV_OUT, 1), lambda i: (0, 0)),                # conv bias
            pl.BlockSpec((hw, POOL_HW), lambda i: (0, 0)),                # pooling matrix^T
            pl.BlockSpec((CONV_OUT * PAD_STRIDE, REPR_SIZE), lambda i: (0, 0)),  # fc6 (padded rows)
            pl.BlockSpec((1, REPR_SIZE), lambda i: (0, 0)),
            pl.BlockSpec((REPR_SIZE, REPR_SIZE), lambda i: (0, 0)),       # fc7
            pl.BlockSpec((1, REPR_SIZE), lambda i: (0, 0)),
            pl.BlockSpec((REPR_SIZE, HEAD_OUT), lambda i: (0, 0)),        # [cls|bbox|pad] predictor
            pl.BlockSpec((1, HEAD_OUT), lambda i: (0, 0)),
        ],
        out_specs=(
            pl.BlockSpec((None, 1, HEAD_OUT), lambda i: (i, 0, 0)),
            pl.BlockSpec((None, 1, HEAD_OUT), lambda i: (i, 0, 0)),
        ),
        out_shape=(
            jax.ShapeDtypeStruct((n, 1, HEAD_OUT), jnp.float32),
            jax.ShapeDtypeStruct((n, 1, HEAD_OUT), jnp.float32),
        ),
        scratch_shapes=[pltpu.VMEM((1, CONV_OUT * PAD_STRIDE), jnp.float32)],
        compiler_params=pltpu.CompilerParams(dimension_semantics=("parallel",)),
    )(patches_t, prep["conv_wt"], prep["conv_b"], prep["pool_t"],
      prep["fc6_wp"], prep["fc6_b"], prep["fc7_w"], prep["fc7_b"],
      prep["pred_w"], prep["pred_b"])


# ----------------------------------------------------------------------------- glue
def im2col_t(x_nhwc, kh, kw, stride, pad):
    """Unfold NHWC image into transposed patch rows (N, KH*KW*C, OH*OW) (static XLA slices)."""
    x = jnp.pad(x_nhwc, ((0, 0), (pad, pad), (pad, pad), (0, 0)))
    n, h, w, c = x.shape
    oh = (h - kh) // stride + 1
    ow = (w - kw) // stride + 1
    cols = []
    for i in range(kh):
        for j in range(kw):
            sl = x[:, i:i + stride * oh:stride, j:j + stride * ow:stride, :]   # (N,OH,OW,C)
            cols.append(jnp.transpose(sl, (0, 3, 1, 2)).reshape(n, c, oh * ow))
    return jnp.concatenate(cols, axis=1), oh, ow       # rows ordered [kh, kw, c]


@functools.lru_cache(maxsize=None)
def make_pool_matrix_t(oh, ow):
    """2x2 average pool over an (oh, ow) map as an (oh*ow, oh//2*ow//2) matrix (transposed)."""
    ph, pw = oh // 2, ow // 2
    p = np.zeros((oh * ow, ph * pw), np.float32)
    for a in range(ph):
        for b in range(pw):
            for dy in range(2):
                for dx in range(2):
                    p[(2 * a + dy) * ow + (2 * b + dx), a * pw + b] = 0.25
    return p


# ----------------------------------------------------------------------------- model
def init_params(key):
    ks = jax.random.split(key, 8)
    s = 0.02
    return {
        # conv stem: Conv2d(3, CONV_OUT, k=3, s=2, p=1) + hardswish; rows ordered [kh,kw,cin]
        "conv_w": s * jax.random.normal(ks[0], (K_PATCH, CONV_OUT), jnp.float32),
        "conv_b": jnp.zeros((CONV_OUT,), jnp.float32),
        # TwoMLPHead; fc6 input flattened channel-major (C, 7, 7) like torchvision
        "fc6_w": s * jax.random.normal(ks[1], (CONV_OUT * POOL_HW, REPR_SIZE), jnp.float32),
        "fc6_b": jnp.zeros((REPR_SIZE,), jnp.float32),
        "fc7_w": s * jax.random.normal(ks[2], (REPR_SIZE, REPR_SIZE), jnp.float32),
        "fc7_b": jnp.zeros((REPR_SIZE,), jnp.float32),
        # FastRCNNPredictor (the replaced box_predictor)
        "cls_w": s * jax.random.normal(ks[3], (REPR_SIZE, NUM_CLASSES), jnp.float32),
        "cls_b": jnp.zeros((NUM_CLASSES,), jnp.float32),
        "bbox_w": s * jax.random.normal(ks[4], (REPR_SIZE, NUM_CLASSES * 4), jnp.float32),
        "bbox_b": jnp.zeros((NUM_CLASSES * 4,), jnp.float32),
    }


def prepare_weights(p):
    """One-time weight preparation: bf16 casts, conv transpose, pooling matrix, padded fc6
    rows and the fused [cls|bbox|pad] predictor weight. Nothing here runs per forward call."""
    # fc6 weight rows scattered to the lane-padded per-channel layout used in the kernel.
    w6 = p["fc6_w"].reshape(CONV_OUT, POOL_HW, REPR_SIZE)
    w6p = jnp.zeros((CONV_OUT, PAD_STRIDE, REPR_SIZE), jnp.float32)
    w6p = w6p.at[:, :POOL_HW, :].set(w6).reshape(CONV_OUT * PAD_STRIDE, REPR_SIZE)

    # fused predictor: cols [0:5]=cls logits, [5:25]=bbox deltas, rest zero pad (lane-dense 128).
    wp = jnp.zeros((REPR_SIZE, HEAD_OUT), jnp.float32)
    wp = wp.at[:, :NUM_CLASSES].set(p["cls_w"])
    wp = wp.at[:, NUM_CLASSES:5 * NUM_CLASSES].set(p["bbox_w"])
    bp = jnp.zeros((HEAD_OUT,), jnp.float32)
    bp = bp.at[:NUM_CLASSES].set(p["cls_b"])
    bp = bp.at[NUM_CLASSES:5 * NUM_CLASSES].set(p["bbox_b"])

    pool_t = jnp.asarray(make_pool_matrix_t(2 * ROI_RES, 2 * ROI_RES))

    return {
        "conv_wt": p["conv_w"].T.astype(jnp.bfloat16),                        # (16, 27)
        "conv_b": p["conv_b"].reshape(CONV_OUT, 1).astype(jnp.float32),       # (16, 1)
        "pool_t": pool_t.astype(jnp.bfloat16),                                # (196, 49)
        "fc6_wp": w6p.astype(jnp.bfloat16),                                   # (2048, 128)
        "fc6_b": p["fc6_b"].reshape(1, -1).astype(jnp.float32),
        "fc7_w": p["fc7_w"].astype(jnp.bfloat16),
        "fc7_b": p["fc7_b"].reshape(1, -1).astype(jnp.float32),
        "pred_w": wp.astype(jnp.bfloat16),                                    # (128, 128)
        "pred_b": bp.reshape(1, -1).astype(jnp.float32),
    }


def faster_rcnn_forward(prep, x_nchw):
    n = x_nchw.shape[0]
    x = jnp.transpose(x_nchw, (0, 2, 3, 1)).astype(jnp.bfloat16)   # NCHW -> NHWC, bf16 activations
    patches_t, oh, ow = im2col_t(x, 3, 3, stride=2, pad=1)         # (N, 27, 196)
    assert oh == 2 * ROI_RES and ow == 2 * ROI_RES

    fused, scores_full = pallas_fused_detector(patches_t, prep)    # single fused kernel dispatch

    cls_logits = fused[:, 0, :NUM_CLASSES]
    bbox_deltas = fused[:, 0, NUM_CLASSES:5 * NUM_CLASSES]
    scores = scores_full[:, 0, :NUM_CLASSES]
    return {
        "class_logits": cls_logits,       # (N, NUM_CLASSES)
        "scores": scores,                 # (N, NUM_CLASSES)
        "box_regression": bbox_deltas,    # (N, NUM_CLASSES * 4)
    }


# ----------------------------------------------------------------------------- reference
def reference_forward(params, x_nchw):
    """Pure-JAX (f32) reference of the same reduced pipeline for correctness checking."""
    x = jnp.transpose(x_nchw, (0, 2, 3, 1)).astype(jnp.float32)
    pt, oh, ow = im2col_t(x, 3, 3, stride=2, pad=1)                 # (N, 27, 196)
    conv = jnp.einsum('kc,nkx->ncx', params["conv_w"], pt) + params["conv_b"][None, :, None]
    h = conv * jnp.clip(conv + 3.0, 0.0, 6.0) / 6.0
    pool_t = jnp.asarray(make_pool_matrix_t(oh, ow))
    pooled = jnp.einsum('ncx,xp->ncp', h, pool_t)                   # (N, 16, 49)
    roi = pooled.reshape(x.shape[0], -1)                            # channel-major (N, 784)
    h6 = jnp.maximum(roi @ params["fc6_w"] + params["fc6_b"], 0.0)
    h7 = jnp.maximum(h6 @ params["fc7_w"] + params["fc7_b"], 0.0)
    cls = h7 @ params["cls_w"] + params["cls_b"]
    bbox = h7 @ params["bbox_w"] + params["bbox_b"]
    return cls, bbox, jax.nn.softmax(cls, axis=-1)


if __name__ == "__main__":
    key = jax.random.PRNGKey(0)
    k_param, k_x = jax.random.split(key)
    params = init_params(k_param)
    prep = prepare_weights(params)   # one-time: casts / transposes / fused predictor weight
    # small image batch: 2 images, 3 channels, 28x28 (stride-2 stem -> 14x14 -> 7x7 ROI)
    x = jax.random.normal(k_x, (2, 3, 28, 28), jnp.float32)

    fwd = jax.jit(faster_rcnn_forward)
    out = fwd(prep, x)
    jax.block_until_ready(out)

    assert out["class_logits"].shape == (2, NUM_CLASSES)
    assert out["scores"].shape == (2, NUM_CLASSES)
    assert out["box_regression"].shape == (2, NUM_CLASSES * 4)
    assert bool(jnp.all(jnp.isfinite(out["scores"])))
    assert bool(jnp.allclose(out["scores"].sum(axis=-1), 1.0, atol=5e-2))

    ref_cls, ref_bbox, ref_scores = reference_forward(params, x)
    assert bool(jnp.allclose(out["class_logits"], ref_cls, atol=1e-2))
    assert bool(jnp.allclose(out["box_regression"], ref_bbox, atol=1e-2))
    assert bool(jnp.allclose(out["scores"], ref_scores, atol=1e-2))

    print("KERNEL_OK")
</pallas_src>

<mosaic_0001>
module attributes {stable_mosaic.version = 11 : i64} {
  func.func @_fused_detector_kernel(%arg0: i32, %arg1: memref<1x27x196xbf16, #tpu.memory_space<vmem>>, %arg2: memref<16x27xbf16, #tpu.memory_space<vmem>>, %arg3: memref<16x1xf32, #tpu.memory_space<vmem>>, %arg4: memref<196x49xbf16, #tpu.memory_space<vmem>>, %arg5: memref<2048x128xbf16, #tpu.memory_space<vmem>>, %arg6: memref<1x128xf32, #tpu.memory_space<vmem>>, %arg7: memref<128x128xbf16, #tpu.memory_space<vmem>>, %arg8: memref<1x128xf32, #tpu.memory_space<vmem>>, %arg9: memref<128x128xbf16, #tpu.memory_space<vmem>>, %arg10: memref<1x128xf32, #tpu.memory_space<vmem>>, %arg11: memref<1x1x128xf32, #tpu.memory_space<vmem>>, %arg12: memref<1x1x128xf32, #tpu.memory_space<vmem>>, %arg13: memref<1x2048xf32, #tpu.memory_space<vmem>>) attributes {dimension_semantics = [#tpu.dimension_semantics<parallel>], iteration_bounds = array<i64: 2>, scalar_prefetch = 0 : i64, scratch_operands = 1 : i64, tpu.core_type = #tpu.core_type<tc>, window_params = [{transform_indices = @transform_0, window_bounds = array<i64: 1, 27, 196>}, {pipeline_mode = #tpu.pipeline_mode<synchronous>, transform_indices = @transform_1, window_bounds = array<i64: 16, 27>}, {pipeline_mode = #tpu.pipeline_mode<synchronous>, transform_indices = @transform_2, window_bounds = array<i64: 16, 1>}, {pipeline_mode = #tpu.pipeline_mode<synchronous>, transform_indices = @transform_3, window_bounds = array<i64: 196, 49>}, {pipeline_mode = #tpu.pipeline_mode<synchronous>, transform_indices = @transform_4, window_bounds = array<i64: 2048, 128>}, {pipeline_mode = #tpu.pipeline_mode<synchronous>, transform_indices = @transform_5, window_bounds = array<i64: 1, 128>}, {pipeline_mode = #tpu.pipeline_mode<synchronous>, transform_indices = @transform_6, window_bounds = array<i64: 128, 128>}, {pipeline_mode = #tpu.pipeline_mode<synchronous>, transform_indices = @transform_7, window_bounds = array<i64: 1, 128>}, {pipeline_mode = #tpu.pipeline_mode<synchronous>, transform_indices = @transform_8, window_bounds = array<i64: 128, 128>}, {pipeline_mode = #tpu.pipeline_mode<synchronous>, transform_indices = @transform_9, window_bounds = array<i64: 1, 128>}, {transform_indices = @transform_10, window_bounds = array<i64: 1, 1, 128>}, {transform_indices = @transform_11, window_bounds = array<i64: 1, 1, 128>}]} {
    %c0 = arith.constant 0 : index
    %c0_0 = arith.constant 0 : index
    %0 = vector.load %arg2[%c0, %c0_0] : memref<16x27xbf16, #tpu.memory_space<vmem>>, vector<16x27xbf16>
    %c0_1 = arith.constant 0 : index
    %c0_2 = arith.constant 0 : index
    %c0_3 = arith.constant 0 : index
    %1 = vector.load %arg1[%c0_1, %c0_2, %c0_3] : memref<1x27x196xbf16, #tpu.memory_space<vmem>>, vector<1x27x196xbf16>
    %2 = vector.shape_cast %1 : vector<1x27x196xbf16> to vector<27x196xbf16>
    %cst = arith.constant dense<0.000000e+00> : vector<16x196xf32>
    %3 = tpu.matmul %0, %2, %cst {dimension_numbers = #tpu.dot_dimension_numbers<[1], [0], [0], [1], [0, 0, 1, 1], [], []>} : vector<16x27xbf16>, vector<27x196xbf16>, vector<16x196xf32> -> vector<16x196xf32>
    %c0_4 = arith.constant 0 : index
    %c0_5 = arith.constant 0 : index
    %4 = vector.load %arg3[%c0_4, %c0_5] : memref<16x1xf32, #tpu.memory_space<vmem>>, vector<16x1xf32>
    %5 = vector.broadcast %4 : vector<16x1xf32> to vector<16x196xf32>
    %6 = arith.addf %3, %5 : vector<16x196xf32>
    %cst_6 = arith.constant 3.000000e+00 : f32
    %7 = vector.broadcast %cst_6 : f32 to vector<16x196xf32>
    %8 = arith.addf %6, %7 : vector<16x196xf32>
    %cst_7 = arith.constant 0.000000e+00 : f32
    %cst_8 = arith.constant 6.000000e+00 : f32
    %9 = vector.broadcast %cst_7 : f32 to vector<16x196xf32>
    %10 = arith.maximumf %9, %8 : vector<16x196xf32>
    %11 = vector.broadcast %cst_8 : f32 to vector<16x196xf32>
    %12 = arith.minimumf %11, %10 : vector<16x196xf32>
    %13 = arith.mulf %6, %12 : vector<16x196xf32>
    %cst_9 = arith.constant 0.166666672 : f32
    %14 = vector.broadcast %cst_9 : f32 to vector<16x196xf32>
    %15 = arith.mulf %13, %14 : vector<16x196xf32>
    %16 = arith.truncf %15 : vector<16x196xf32> to vector<16x196xbf16>
    %c0_10 = arith.constant 0 : index
    %c0_11 = arith.constant 0 : index
    %17 = vector.load %arg4[%c0_10, %c0_11] : memref<196x49xbf16, #tpu.memory_space<vmem>>, vector<196x49xbf16>
    %cst_12 = arith.constant dense<0.000000e+00> : vector<16x49xf32>
    %18 = tpu.matmul %16, %17, %cst_12 {dimension_numbers = #tpu.dot_dimension_numbers<[1], [0], [0], [1], [0, 0, 1, 1], [], []>} : vector<16x196xbf16>, vector<196x49xbf16>, vector<16x49xf32> -> vector<16x49xf32>
    %cst_13 = arith.constant 0.000000e+00 : f32
    %19 = vector.broadcast %cst_13 : f32 to vector<1x2048xf32>
    %c0_14 = arith.constant 0 : index
    %c0_15 = arith.constant 0 : index
    %20 = vector.load %arg13[%c0_14, %c0_15] : memref<1x2048xf32, #tpu.memory_space<vmem>>, vector<1x2048xf32>
    tpu.vector_store %arg13[%c0_14, %c0_15], %19 {strides = array<i32>} : memref<1x2048xf32, #tpu.memory_space<vmem>>, vector<1x2048xf32>,
    %21 = vector.extract_strided_slice %18 {offsets = [0, 0], sizes = [1, 49], strides = [1, 1]} : vector<16x49xf32> to vector<1x49xf32>
    %c0_16 = arith.constant 0 : index
    %c0_17 = arith.constant 0 : index
    %22 = vector.load %arg13[%c0_16, %c0_17] : memref<1x2048xf32, #tpu.memory_space<vmem>>, vector<1x49xf32>
    tpu.vector_store %arg13[%c0_16, %c0_17], %21 {strides = array<i32>} : memref<1x2048xf32, #tpu.memory_space<vmem>>, vector<1x49xf32>,
    %23 = vector.extract_strided_slice %18 {offsets = [1, 0], sizes = [1, 49], strides = [1, 1]} : vector<16x49xf32> to vector<1x49xf32>
    %c0_18 = arith.constant 0 : index
    %c128 = arith.constant 128 : index
    %24 = vector.load %arg13[%c0_18, %c128] : memref<1x2048xf32, #tpu.memory_space<vmem>>, vector<1x49xf32>
    tpu.vector_store %arg13[%c0_18, %c128], %23 {strides = array<i32>} : memref<1x2048xf32, #tpu.memory_space<vmem>>, vector<1x49xf32>,
    %25 = vector.extract_strided_slice %18 {offsets = [2, 0], sizes = [1, 49], strides = [1, 1]} : vector<16x49xf32> to vector<1x49xf32>
    %c0_19 = arith.constant 0 : index
    %c256 = arith.constant 256 : index
    %26 = vector.load %arg13[%c0_19, %c256] : memref<1x2048xf32, #tpu.memory_space<vmem>>, vector<1x49xf32>
    tpu.vector_store %arg13[%c0_19, %c256], %25 {strides = array<i32>} : memref<1x2048xf32, #tpu.memory_space<vmem>>, vector<1x49xf32>,
    %27 = vector.extract_strided_slice %18 {offsets = [3, 0], sizes = [1, 49], strides = [1, 1]} : vector<16x49xf32> to vector<1x49xf32>
    %c0_20 = arith.constant 0 : index
    %c384 = arith.constant 384 : index
    %28 = vector.load %arg13[%c0_20, %c384] : memref<1x2048xf32, #tpu.memory_space<vmem>>, vector<1x49xf32>
    tpu.vector_store %arg13[%c0_20, %c384], %27 {strides = array<i32>} : memref<1x2048xf32, #tpu.memory_space<vmem>>, vector<1x49xf32>,
    %29 = vector.extract_strided_slice %18 {offsets = [4, 0], sizes = [1, 49], strides = [1, 1]} : vector<16x49xf32> to vector<1x49xf32>
    %c0_21 = arith.constant 0 : index
    %c512 = arith.constant 512 : index
    %30 = vector.load %arg13[%c0_21, %c512] : memref<1x2048xf32, #tpu.memory_space<vmem>>, vector<1x49xf32>
    tpu.vector_store %arg13[%c0_21, %c512], %29 {strides = array<i32>} : memref<1x2048xf32, #tpu.memory_space<vmem>>, vector<1x49xf32>,
    %31 = vector.extract_strided_slice %18 {offsets = [5, 0], sizes = [1, 49], strides = [1, 1]} : vector<16x49xf32> to vector<1x49xf32>
    %c0_22 = arith.constant 0 : index
    %c640 = arith.constant 640 : index
    %32 = vector.load %arg13[%c0_22, %c640] : memref<1x2048xf32, #tpu.memory_space<vmem>>, vector<1x49xf32>
    tpu.vector_store %arg13[%c0_22, %c640], %31 {strides = array<i32>} : memref<1x2048xf32, #tpu.memory_space<vmem>>, vector<1x49xf32>,
    %33 = vector.extract_strided_slice %18 {offsets = [6, 0], sizes = [1, 49], strides = [1, 1]} : vector<16x49xf32> to vector<1x49xf32>
    %c0_23 = arith.constant 0 : index
    %c768 = arith.constant 768 : index
    %34 = vector.load %arg13[%c0_23, %c768] : memref<1x2048xf32, #tpu.memory_space<vmem>>, vector<1x49xf32>
    tpu.vector_store %arg13[%c0_23, %c768], %33 {strides = array<i32>} : memref<1x2048xf32, #tpu.memory_space<vmem>>, vector<1x49xf32>,
    %35 = vector.extract_strided_slice %18 {offsets = [7, 0], sizes = [1, 49], strides = [1, 1]} : vector<16x49xf32> to vector<1x49xf32>
    %c0_24 = arith.constant 0 : index
    %c896 = arith.constant 896 : index
    %36 = vector.load %arg13[%c0_24, %c896] : memref<1x2048xf32, #tpu.memory_space<vmem>>, vector<1x49xf32>
    tpu.vector_store %arg13[%c0_24, %c896], %35 {strides = array<i32>} : memref<1x2048xf32, #tpu.memory_space<vmem>>, vector<1x49xf32>,
    %37 = vector.extract_strided_slice %18 {offsets = [8, 0], sizes = [1, 49], strides = [1, 1]} : vector<16x49xf32> to vector<1x49xf32>
    %c0_25 = arith.constant 0 : index
    %c1024 = arith.constant 1024 : index
    %38 = vector.load %arg13[%c0_25, %c1024] : memref<1x2048xf32, #tpu.memory_space<vmem>>, vector<1x49xf32>
    tpu.vector_store %arg13[%c0_25, %c1024], %37 {strides = array<i32>} : memref<1x2048xf32, #tpu.memory_space<vmem>>, vector<1x49xf32>,
    %39 = vector.extract_strided_slice %18 {offsets = [9, 0], sizes = [1, 49], strides = [1, 1]} : vector<16x49xf32> to vector<1x49xf32>
    %c0_26 = arith.constant 0 : index
    %c1152 = arith.constant 1152 : index
    %40 = vector.load %arg13[%c0_26, %c1152] : memref<1x2048xf32, #tpu.memory_space<vmem>>, vector<1x49xf32>
    tpu.vector_store %arg13[%c0_26, %c1152], %39 {strides = array<i32>} : memref<1x2048xf32, #tpu.memory_space<vmem>>, vector<1x49xf32>,
    %41 = vector.extract_strided_slice %18 {offsets = [10, 0], sizes = [1, 49], strides = [1, 1]} : vector<16x49xf32> to vector<1x49xf32>
    %c0_27 = arith.constant 0 : index
    %c1280 = arith.constant 1280 : index
    %42 = vector.load %arg13[%c0_27, %c1280] : memref<1x2048xf32, #tpu.memory_space<vmem>>, vector<1x49xf32>
    tpu.vector_store %arg13[%c0_27, %c1280], %41 {strides = array<i32>} : memref<1x2048xf32, #tpu.memory_space<vmem>>, vector<1x49xf32>,
    %43 = vector.extract_strided_slice %18 {offsets = [11, 0], sizes = [1, 49], strides = [1, 1]} : vector<16x49xf32> to vector<1x49xf32>
    %c0_28 = arith.constant 0 : index
    %c1408 = arith.constant 1408 : index
    %44 = vector.load %arg13[%c0_28, %c1408] : memref<1x2048xf32, #tpu.memory_space<vmem>>, vector<1x49xf32>
    tpu.vector_store %arg13[%c0_28, %c1408], %43 {strides = array<i32>} : memref<1x2048xf32, #tpu.memory_space<vmem>>, vector<1x49xf32>,
    %45 = vector.extract_strided_slice %18 {offsets = [12, 0], sizes = [1, 49], strides = [1, 1]} : vector<16x49xf32> to vector<1x49xf32>
    %c0_29 = arith.constant 0 : index
    %c1536 = arith.constant 1536 : index
    %46 = vector.load %arg13[%c0_29, %c1536] : memref<1x2048xf32, #tpu.memory_space<vmem>>, vector<1x49xf32>
    tpu.vector_store %arg13[%c0_29, %c1536], %45 {strides = array<i32>} : memref<1x2048xf32, #tpu.memory_space<vmem>>, vector<1x49xf32>,
    %47 = vector.extract_strided_slice %18 {offsets = [13, 0], sizes = [1, 49], strides = [1, 1]} : vector<16x49xf32> to vector<1x49xf32>
    %c0_30 = arith.constant 0 : index
    %c1664 = arith.constant 1664 : index
    %48 = vector.load %arg13[%c0_30, %c1664] : memref<1x2048xf32, #tpu.memory_space<vmem>>, vector<1x49xf32>
    tpu.vector_store %arg13[%c0_30, %c1664], %47 {strides = array<i32>} : memref<1x2048xf32, #tpu.memory_space<vmem>>, vector<1x49xf32>,
    %49 = vector.extract_strided_slice %18 {offsets = [14, 0], sizes = [1, 49], strides = [1, 1]} : vector<16x49xf32> to vector<1x49xf32>
    %c0_31 = arith.constant 0 : index
    %c1792 = arith.constant 1792 : index
    %50 = vector.load %arg13[%c0_31, %c1792] : memref<1x2048xf32, #tpu.memory_space<vmem>>, vector<1x49xf32>
    tpu.vector_store %arg13[%c0_31, %c1792], %49 {strides = array<i32>} : memref<1x2048xf32, #tpu.memory_space<vmem>>, vector<1x49xf32>,
    %51 = vector.extract_strided_slice %18 {offsets = [15, 0], sizes = [1, 49], strides = [1, 1]} : vector<16x49xf32> to vector<1x49xf32>
    %c0_32 = arith.constant 0 : index
    %c1920 = arith.constant 1920 : index
    %52 = vector.load %arg13[%c0_32, %c1920] : memref<1x2048xf32, #tpu.memory_space<vmem>>, vector<1x49xf32>
    tpu.vector_store %arg13[%c0_32, %c1920], %51 {strides = array<i32>} : memref<1x2048xf32, #tpu.memory_space<vmem>>, vector<1x49xf32>,
    %c0_33 = arith.constant 0 : index
    %c0_34 = arith.constant 0 : index
    %53 = vector.load %arg13[%c0_33, %c0_34] : memref<1x2048xf32, #tpu.memory_space<vmem>>, vector<1x2048xf32>
    %54 = arith.truncf %53 : vector<1x2048xf32> to vector<1x2048xbf16>
    %c0_35 = arith.constant 0 : index
    %c0_36 = arith.constant 0 : index
    %55 = vector.load %arg5[%c0_35, %c0_36] : memref<2048x128xbf16, #tpu.memory_space<vmem>>, vector<2048x128xbf16>
    %cst_37 = arith.constant dense<0.000000e+00> : vector<1x128xf32>
    %56 = tpu.matmul %54, %55, %cst_37 {dimension_numbers = #tpu.dot_dimension_numbers<[1], [0], [0], [1], [0, 0, 1, 1], [], []>} : vector<1x2048xbf16>, vector<2048x128xbf16>, vector<1x128xf32> -> vector<1x128xf32>
    %c0_38 = arith.constant 0 : index
    %c0_39 = arith.constant 0 : index
    %57 = vector.load %arg6[%c0_38, %c0_39] : memref<1x128xf32, #tpu.memory_space<vmem>>, vector<1x128xf32>
    %58 = arith.addf %56, %57 : vector<1x128xf32>
    %cst_40 = arith.constant 0.000000e+00 : f32
    %59 = vector.broadcast %cst_40 : f32 to vector<1x128xf32>
    %60 = arith.maximumf %58, %59 : vector<1x128xf32>
    %61 = arith.truncf %60 : vector<1x128xf32> to vector<1x128xbf16>
    %c0_41 = arith.constant 0 : index
    %c0_42 = arith.constant 0 : index
    %62 = vector.load %arg7[%c0_41, %c0_42] : memref<128x128xbf16, #tpu.memory_space<vmem>>, vector<128x128xbf16>
    %cst_43 = arith.constant dense<0.000000e+00> : vector<1x128xf32>
    %63 = tpu.matmul %61, %62, %cst_43 {dimension_numbers = #tpu.dot_dimension_numbers<[1], [0], [0], [1], [0, 0, 1, 1], [], []>} : vector<1x128xbf16>, vector<128x128xbf16>, vector<1x128xf32> -> vector<1x128xf32>
    %c0_44 = arith.constant 0 : index
    %c0_45 = arith.constant 0 : index
    %64 = vector.load %arg8[%c0_44, %c0_45] : memref<1x128xf32, #tpu.memory_space<vmem>>, vector<1x128xf32>
    %65 = arith.addf %63, %64 : vector<1x128xf32>
    %cst_46 = arith.constant 0.000000e+00 : f32
    %66 = vector.broadcast %cst_46 : f32 to vector<1x128xf32>
    %67 = arith.maximumf %65, %66 : vector<1x128xf32>
    %68 = arith.truncf %67 : vector<1x128xf32> to vector<1x128xbf16>
    %c0_47 = arith.constant 0 : index
    %c0_48 = arith.constant 0 : index
    %69 = vector.load %arg9[%c0_47, %c0_48] : memref<128x128xbf16, #tpu.memory_space<vmem>>, vector<128x128xbf16>
    %cst_49 = arith.constant dense<0.000000e+00> : vector<1x128xf32>
    %70 = tpu.matmul %68, %69, %cst_49 {dimension_numbers = #tpu.dot_dimension_numbers<[1], [0], [0], [1], [0, 0, 1, 1], [], []>} : vector<1x128xbf16>, vector<128x128xbf16>, vector<1x128xf32> -> vector<1x128xf32>
    %c0_50 = arith.constant 0 : index
    %c0_51 = arith.constant 0 : index
    %71 = vector.load %arg10[%c0_50, %c0_51] : memref<1x128xf32, #tpu.memory_space<vmem>>, vector<1x128xf32>
    %72 = arith.addf %70, %71 : vector<1x128xf32>
    %c0_52 = arith.constant 0 : index
    %c0_53 = arith.constant 0 : index
    %c0_54 = arith.constant 0 : index
    %73 = vector.load %arg11[%c0_52, %c0_53, %c0_54] : memref<1x1x128xf32, #tpu.memory_space<vmem>>, vector<1x1x128xf32>
    %74 = vector.shape_cast %73 : vector<1x1x128xf32> to vector<1x128xf32>
    %75 = vector.shape_cast %72 : vector<1x128xf32> to vector<1x1x128xf32>
    tpu.vector_store %arg11[%c0_52, %c0_53, %c0_54], %75 {strides = array<i32>} : memref<1x1x128xf32, #tpu.memory_space<vmem>>, vector<1x1x128xf32>,
    %76 = tpu.iota {dimensions = array<i32: 1>} : vector<1x128xi32>
    %c5_i32 = arith.constant 5 : i32
    %77 = vector.broadcast %c5_i32 : i32 to vector<1x128xi32>
    %78 = arith.cmpi slt, %76, %77 : vector<1x128xi32>
    %cst_55 = arith.constant -1.000000e+30 : f32
    %79 = vector.broadcast %cst_55 : f32 to vector<1x128xf32>
    %80 = arith.select %78, %72, %79 : vector<1x128xi1>, vector<1x128xf32>
    %cst_56 = arith.constant dense<0xFF800000> : vector<1xf32>
    %81 = vector.multi_reduction <maximumf>, %80, %cst_56 [1] : vector<1x128xf32> to vector<1xf32>
    %82 = vector.shape_cast %81 : vector<1xf32> to vector<1x1xf32>
    %83 = vector.broadcast %82 : vector<1x1xf32> to vector<1x128xf32>
    %84 = arith.subf %80, %83 : vector<1x128xf32>
    %85 = math.exp %84 : vector<1x128xf32>
    %cst_57 = arith.constant dense<0.000000e+00> : vector<1xf32>
    %86 = vector.multi_reduction <add>, %85, %cst_57 [1] : vector<1x128xf32> to vector<1xf32>
    %87 = vector.shape_cast %86 : vector<1xf32> to vector<1x1xf32>
    %88 = vector.broadcast %87 : vector<1x1xf32> to vector<1x128xf32>
    %89 = arith.divf %85, %88 : vector<1x128xf32>
    %c0_58 = arith.constant 0 : index
    %c0_59 = arith.constant 0 : index
    %c0_60 = arith.constant 0 : index
    %90 = vector.load %arg12[%c0_58, %c0_59, %c0_60] : memref<1x1x128xf32, #tpu.memory_space<vmem>>, vector<1x1x128xf32>
    %91 = vector.shape_cast %90 : vector<1x1x128xf32> to vector<1x128xf32>
    %92 = vector.shape_cast %89 : vector<1x128xf32> to vector<1x1x128xf32>
    tpu.vector_store %arg12[%c0_58, %c0_59, %c0_60], %92 {strides = array<i32>} : memref<1x1x128xf32, #tpu.memory_space<vmem>>, vector<1x1x128xf32>,
    return
  }
  func.func @transform_0(%arg0: i32) -> (i32, i32, i32) {
    %c0_i32 = arith.constant 0 : i32
    %c0_i32_0 = arith.constant 0 : i32
    %c0_i32_1 = arith.constant 0 : i32
    return %arg0, %c0_i32, %c0_i32_0 : i32, i32, i32
  }
  func.func @transform_1(%arg0: i32) -> (i32, i32) {
    %c0_i32 = arith.constant 0 : i32
    %c0_i32_0 = arith.constant 0 : i32
    %c0_i32_1 = arith.constant 0 : i32
    return %c0_i32, %c0_i32_0 : i32, i32
  }
  func.func @transform_2(%arg0: i32) -> (i32, i32) {
    %c0_i32 = arith.constant 0 : i32
    %c0_i32_0 = arith.constant 0 : i32
    %c0_i32_1 = arith.constant 0 : i32
    return %c0_i32, %c0_i32_0 : i32, i32
  }
  func.func @transform_3(%arg0: i32) -> (i32, i32) {
    %c0_i32 = arith.constant 0 : i32
    %c0_i32_0 = arith.constant 0 : i32
    %c0_i32_1 = arith.constant 0 : i32
    return %c0_i32, %c0_i32_0 : i32, i32
  }
  func.func @transform_4(%arg0: i32) -> (i32, i32) {
    %c0_i32 = arith.constant 0 : i32
    %c0_i32_0 = arith.constant 0 : i32
    %c0_i32_1 = arith.constant 0 : i32
    return %c0_i32, %c0_i32_0 : i32, i32
  }
  func.func @transform_5(%arg0: i32) -> (i32, i32) {
    %c0_i32 = arith.constant 0 : i32
    %c0_i32_0 = arith.constant 0 : i32
    %c0_i32_1 = arith.constant 0 : i32
    return %c0_i32, %c0_i32_0 : i32, i32
  }
  func.func @transform_6(%arg0: i32) -> (i32, i32) {
    %c0_i32 = arith.constant 0 : i32
    %c0_i32_0 = arith.constant 0 : i32
    %c0_i32_1 = arith.constant 0 : i32
    return %c0_i32, %c0_i32_0 : i32, i32
  }
  func.func @transform_7(%arg0: i32) -> (i32, i32) {
    %c0_i32 = arith.constant 0 : i32
    %c0_i32_0 = arith.constant 0 : i32
    %c0_i32_1 = arith.constant 0 : i32
    return %c0_i32, %c0_i32_0 : i32, i32
  }
  func.func @transform_8(%arg0: i32) -> (i32, i32) {
    %c0_i32 = arith.constant 0 : i32
    %c0_i32_0 = arith.constant 0 : i32
    %c0_i32_1 = arith.constant 0 : i32
    return %c0_i32, %c0_i32_0 : i32, i32
  }
  func.func @transform_9(%arg0: i32) -> (i32, i32) {
    %c0_i32 = arith.constant 0 : i32
    %c0_i32_0 = arith.constant 0 : i32
    %c0_i32_1 = arith.constant 0 : i32
    return %c0_i32, %c0_i32_0 : i32, i32
  }
  func.func @transform_10(%arg0: i32) -> (i32, i32, i32) {
    %c0_i32 = arith.constant 0 : i32
    %c0_i32_0 = arith.constant 0 : i32
    %c0_i32_1 = arith.constant 0 : i32
    return %arg0, %c0_i32, %c0_i32_0 : i32, i32, i32
  }
  func.func @transform_11(%arg0: i32) -> (i32, i32, i32) {
    %c0_i32 = arith.constant 0 : i32
    %c0_i32_0 = arith.constant 0 : i32
    %c0_i32_1 = arith.constant 0 : i32
    return %arg0, %c0_i32, %c0_i32_0 : i32, i32, i32
  }
}

</mosaic_0001>

<bundles_post_ra>
// kernel: faster_rcnn_forward.1
= control target key start
LH: loop header
LB: loop body
LE: loop exit
PB: predicated region body
PF: predicated region fallthrough
CT: control target
= control target key end

     0   :  { %s4042_s0 = inlined_call_operand.vmem [shape: bf16[2,27,196], index: 0, kind: input, shape index: {}]   ;;  %s4043_s1 = inlined_call_operand.vmem [shape: bf16[16,27], index: 1, kind: input, shape index: {}]   ;;  %s4044_s2 = inlined_call_operand.vmem [shape: f32[16,1], index: 2, kind: input, shape index: {}]   ;;  %s4045_s3 = inlined_call_operand.vmem [shape: bf16[196,49], index: 3, kind: input, shape index: {}]   ;;  %s4046_s4 = inlined_call_operand.vmem [shape: bf16[2048,128], index: 4, kind: input, shape index: {}]   ;;  %s4047_s5 = inlined_call_operand.vmem [shape: f32[1,128], index: 5, kind: input, shape index: {}]   ;;  %s4048_s6 = inlined_call_operand.vmem [shape: bf16[128,128], index: 6, kind: input, shape index: {}]   ;;  %s4049_s7 = inlined_call_operand.vmem [shape: f32[1,128], index: 7, kind: input, shape index: {}]   ;;  %s4050_s8 = inlined_call_operand.vmem [shape: bf16[128,128], index: 8, kind: input, shape index: {}]   ;;  %s4051_s9 = inlined_call_operand.vmem [shape: f32[1,128], index: 9, kind: input, shape index: {}]   ;;  %s4052_s10 = inlined_call_operand.vmem [shape: f32[2,1,128], index: 10, kind: output, shape index: {0}]   ;;  %s4053_s11 = inlined_call_operand.hbm [shape: f32[2,1,128], index: 11, kind: output, shape index: {1}]  }
   0x1   :  { %4054 = sst [smem:[#allocation6_spill]] %s4042_s0 }
   0x2   :  { %4055 = sst [smem:[#allocation7_spill]] %s4043_s1 }
   0x3   :  { %17 = vsyncpa [#allocation4], 0 }
   0x4   :  { %19 = vsyncpa [#allocation4 + $0x1], 0  ;;  %s3318_s17 = smov 0   ;;  %s3320_s18 = smov 0  }
   0x5   :  { %s3322_s19 = smov 0   ;;  %s3324_s20 = smov 0  }
   0x6 LB: > { %s3339_s21 = sadd.s32 4294967295, %s3250_s20   ;;  %s2569_s22 = sadd.s32 4294967294, %s3250_s20   ;;  %s3250_s20 = sphi %s3324_s20, %s4065_s20   ;;  %s3246_s19 = sphi %s3322_s19, %s4064_s19   ;;  %s3242_s18 = sphi %s3320_s18, %s4063_s18   ;;  %s3238_s17 = sphi %s3318_s17, %s4062_s17  }
   0x7   : > { %s3343_s23 = sadd.s32 1, %s3250_s20   ;;  %s273_s24 = sadd.s32 1, %s3246_s19 }
   0x8   : > { %s270_s25 = ssub.s32 %s3250_s20, %s3343_s23  ;;  %p283_p0 = scmp.ne.s32.totalorder %s3246_s19, %s3242_s18 }
   0x9   : > { %p271_p1 = scmp.eq.s32.totalorder %s270_s25, 0  ;;  %p284_p2 = scmp.eq.s32.totalorder %s3339_s21, 1 }
   0xa   : > { %p289_p3 = scmp.ne.s32.totalorder %s3242_s18, %s3238_s17  ;;  %p290_p4 = scmp.eq.s32.totalorder %s2569_s22, 1 }
   0xb   : > { %s3354_s26 = scalar_select %p271_p1, %s3246_s19, %s273_s24  }
   0xc   : > { %p3356_p5 = por %p284_p2, %p283_p0  ;;  %p3360_p6 = por %p290_p4, %p289_p3 }
   0xd   : > { %p2572_p7 = scmp.ge.s32.totalorder %s3250_s20, 1  ;;  %p343_p8 = scmp.lt.s32.totalorder %s3250_s20, 3 }
   0xf   : > { %p344_p9 = pnand %p2572_p7, %p343_p8 }
  0x10   : > { %p385_p10 = scmp.lt.s32.totalorder (!%p344_p9), %s3339_s21, 1  ;;  %s4058_s0 = sld [smem:[#allocation6_spill]] (!%p344_p9) }
  0x11   : > { %347 = sbr.rel (%p344_p9) target bundleno = 1518 (0x5ee), region = 60  ;;  %s4059_s1 = sld [smem:[#allocation7_spill]] (!%p344_p9) }
  0x12   : > { %s2739_s22 = sshll.u32 (!%p344_p9), %s3339_s21, 4  ;;  %s3257_s15 = smov (!%p344_p9), [#allocation3]  }
  0x16   : > { %vm439_vm0 = vcmask 1044480   ;;  %v3252_v0 = vmov 0   ;;  %s3370_s29 = scalar_select %p385_p10, %s3339_s21, 1  ;;  %vm440_vm1 = vcmask 1045504   ;;  %v3253_v1 = vmov 65535   ;;  %v400_v3 = vld [vmem:[%s4044_s2] sm:$0xff] }
  0x17   : > { %481 = vmatprep.mubr.bf16.mxu1 %v3252_v0  ;;  %3021 = vset.pattern.permute.xlu0 %v3252_v0  ;;  %v441_v2 = vsel %vm439_vm0, 4294967295, %v3253_v1  ;;  %v401_v4 = vld [vmem:[%s4044_s2 + $0x8] sm:$0xff]  ;;  %v3028_v12 = vld [vmem:[%s4059_s1] sm:$0xff]   ;;  %vm435_vm2 = vcmask 220160   ;;  %v3029_v13 = vld [vmem:[%s4045_s3 + $0x38] sm:$0xff]   ;;  %vm618_vm3 = vcmask 1041408  }
  0x18   : > { %404 = vperm.xlu0 %3021, %v400_v3   ;;  %s2742_s13 = sshll.u32 %s3370_s29, 5  ;;  %v442_v5 = vsel %vm440_vm1, %v441_v2, 0  ;;  %v3030_v14 = vld [vmem:[%s4045_s3 + $0x30] sm:$0xff]   ;;  %v3031_v15 = vld [vmem:[%s4045_s3 + $0x28] sm:$0xff]   ;;  %v3032_v16 = vld [vmem:[%s4045_s3 + $0x20] sm:$0xff]   ;;  %vm614_vm4 = vcmask 556032   ;;  %s392_s16 = scalar_lea.vmem %s4052_s10, %s3370_s29 }
  0x19   : > { %s389_s24 = scalar_lea.vmem %s4058_s0, %s2742_s13  ;;  %v3033_v17 = vld [vmem:[%s4045_s3 + $0x18] sm:$0xff]   ;;  %v3034_v18 = vld [vmem:[%s4045_s3 + $0x10] sm:$0xff]   ;;  %v3035_v19 = vld [vmem:[%s4045_s3 + $0x8] sm:$0xff]   ;;  %vm3256_vm6 = vmmov 0   ;;  %vm2463_vm8 = vcmask 1040384   ;;  %s383_s29 = sand.u32 1, %s3242_s18  }
  0x1a   : > { %v3022_v6 = vld [vmem:[%s389_s24 + $0x14] ss:$8 sps:$4 sm:$0x3f]   ;;  %v3024_v7 = vld [vmem:[%s389_s24 + $0x10] ss:$8 sps:$4 sm:$0x3f]   ;;  %s2493_s0 = scalar_lea.hbm %s4053_s11, %s2739_s22 }
  0x1b   : > { %v447_v8 = vand.u32 %v3022_v6, %v442_v5  ;;  %v3025_v9 = vld [vmem:[%s389_s24 + $0x4] ss:$8 sps:$4 sm:$0xff]   ;;  %v444_v10 = vand.u32 %v3024_v7, %v442_v5  ;;  %v3027_v11 = vld [vmem:[%s389_s24] ss:$8 sps:$4 sm:$0xff]   ;;  %v3038_v23 = vld [vmem:[%s4045_s3 + $0x58] sm:$0xff]   ;;  %v3254_v7 = vmov 0.0  }
  0x1c   : > { %409 = vperm.xlu0 %3021, %v401_v4   ;;  %v3036_v20 = vld [vmem:[%s4045_s3] sm:$0xff]   ;;  %v3039_v24 = vld [vmem:[%s4045_s3 + $0x50] sm:$0xff]   ;;  %v3040_v25 = vld [vmem:[%s4045_s3 + $0x48] sm:$0xff]   ;;  %663 = vst [vmem:[#allocation2] sm:$0xff] %v3254_v7  ;;  %s384_s24 = scalar_lea.vmem [#allocation3], %s383_s29  ;;  %s2480_s14 = scalar_lea.sflag [#allocation4], %s383_s29 }
  0x1d   : > { %461 = vmatprep.subr.bf16.mxu1 %v447_v8  ;;  %v3037_v21 = vld [vmem:[%s4045_s3 + $0x60] ss:$0 sps:$4 sm:$0x33]   ;;  %v3042_v27 = vld [vmem:[%s4046_s4 + $0x78] sm:$0xff]   ;;  %v3046_v30 = vld [vmem:[%s4046_s4 + $0x70] sm:$0xff]   ;;  %664 = vst [vmem:[#allocation2 + $0x8] sm:$0xff] %v3254_v7 }
  0x1e   : > { %462 = vmatpush1.bf16.msra.mxu1 %v444_v10  ;;  %v620_v22 = vsel %vm618_vm3, %v3037_v21, 0  ;;  %v3041_v26 = vld [vmem:[%s4045_s3 + $0x40] sm:$0xff]   ;;  %v3043_v28 = vld [vmem:[%s4046_s4 + $0x178] sm:$0xff]   ;;  %2743 = vmatprep.subr.bf16.mxu0 %v3042_v27  ;;  %v3048_v31 = vld [vmem:[%s4046_s4 + $0x30] sm:$0xff]   ;;  %s2495_s25 = sshll.u32 %s384_s24, 4  ;;  %s2496_s25 = int_to_ptr.vmem [resolvable:$true] %s2495_s25 }
  0x1f   : > { %463 = vmatprep.subr.bf16.mxu1 %v3025_v9  ;;  %v3044_v29 = vld [vmem:[%s4046_s4 + $0x38] sm:$0xff]   ;;  %v3050_v32 = vld [vmem:[%s4046_s4 + $0x68] sm:$0xff]   ;;  %v3047_v2 = vld [vmem:[%s4046_s4 + $0x170] sm:$0xff]   ;;  %s3190_s13 = scalar_lea.vmem %s2496_s25, 16 }
  0x20   : > { %2744 = vmatpush3.bf16.msra.mxu0 %v3044_v29  ;;  %v3049_v3 = vld [vmem:[%s4046_s4 + $0x130] sm:$0xff]   ;;  %v3051_v4 = vld [vmem:[%s4046_s4 + $0x168] sm:$0xff]   ;;  %v3054_v8 = vld [vmem:[%s4046_s4 + $0x60] sm:$0xff]   ;;  %p3191_p11 = scmp.ne.s32.totalorder %s2496_s25, %s3190_s13 }
  0x21   : > { %2745 = vmatprep.subr.bf16.mxu0 %v3046_v30  ;;  %v3052_v5 = vld [vmem:[%s4046_s4 + $0x28] sm:$0xff]   ;;  %v3055_v9 = vld [vmem:[%s4046_s4 + $0x160] sm:$0xff]   ;;  %v3075_v29 = vld [vmem:[%s4046_s4 + $0x278] sm:$0xff]   ;;  %v665_v30 = vlaneseq }
  0x22   : > { %464 = vmatpush1.bf16.msra.mxu1 %v3027_v11  ;;  %v3053_v6 = vld [vmem:[%s4046_s4 + $0x128] sm:$0xff]   ;;  %v3056_v10 = vld [vmem:[%s4046_s4 + $0x20] sm:$0xff]   ;;  %p3192_p12 = pnand %p3191_p11, %p3356_p5 }
  0x23   : > { %622 = vmatprep.subr.bf16.mxu1 %v3252_v0  ;;  %v3057_v11 = vld [vmem:[%s4046_s4 + $0x120] sm:$0xff]   ;;  %v3067_v21 = vld [vmem:[%s4046_s4 + $0x148] sm:$0xff]   ;;  %vm3546_vm5 = vcmp.lt.s32.totalorder %v665_v30, 49 }
  0x24   : > { %2746 = vmatpush3.bf16.msra.mxu0 %v3048_v31  ;;  %v3073_v27 = vld [vmem:[%s4046_s4 + $0x100] sm:$0xff]   ;;  %v3255_v31 = vmov 1966171168   ;;  %p3193_p13 = pneg %p3192_p12 }
  0x25   : > { %2580 = vmatmul.mubr.msk.bf16.vlgmr.msra.gmra.mxu1 %vm435_vm2, %v3028_v12  ;;  %2747 = vmatprep.subr.bf16.mxu0 %v3050_v32  ;;  %v3058_v12 = vld [vmem:[%s4046_s4 + $0x58] sm:$0xff]   ;;  %v672_v32 = vunpack.c.l.s4 %v3255_v31  ;;  %v3081_v31 = vld [vmem:[%s4046_s4 + $0x230] sm:$0xff]  }
  0x26   : > { %623 = vmatpush1.bf16.msra.mxu1 %v3029_v13  ;;  %v3059_v13 = vld [vmem:[%s4046_s4 + $0x158] sm:$0xff]  }
  0x27   : > { %624 = vmatprep.subr.bf16.mxu1 %v3252_v0 }
  0x28   : > { %2748 = vmatpush3.bf16.msra.mxu0 %v3052_v5 }
  0x29   : > { %2749 = vmatprep.subr.bf16.mxu0 %v3054_v8 }
  0x2a   : > { %625 = vmatpush1.bf16.msra.mxu1 %v3030_v14  ;;  %v3060_v14 = vld [vmem:[%s4046_s4 + $0x18] sm:$0xff]  }
  0x2b   : > { %626 = vmatprep.subr.bf16.mxu1 %v3252_v0 }
  0x2c   : > { %2750 = vmatpush3.bf16.msra.mxu0 %v3056_v10 }
  0x2d   : > { %2751 = vmatprep.subr.bf16.mxu0 %v3058_v12 }
  0x2e   : > { %627 = vmatpush1.bf16.msra.mxu1 %v3031_v15  ;;  %v3061_v15 = vld [vmem:[%s4046_s4 + $0x118] sm:$0xff]  }
  0x2f   : > { %628 = vmatprep.subr.bf16.mxu1 %v3252_v0 }
  0x30   : > { %2752 = vmatpush3.bf16.msra.mxu0 %v3060_v14 }
  0x32   : > { %629 = vmatpush1.bf16.msra.mxu1 %v3032_v16  ;;  %v3062_v16 = vld [vmem:[%s4046_s4 + $0x50] sm:$0xff]  }
  0x33   : > { %630 = vmatprep.subr.bf16.mxu1 %v3252_v0  ;;  %2753 = vmatprep.subr.bf16.mxu0 %v3062_v16 }
  0x36   : > { %631 = vmatpush1.bf16.msra.mxu1 %v3033_v17  ;;  %v3063_v17 = vld [vmem:[%s4046_s4 + $0x150] sm:$0xff]  }
  0x37   : > { %632 = vmatprep.subr.bf16.mxu1 %v3252_v0 }
  0x3a   : > { %633 = vmatpush1.bf16.msra.mxu1 %v3034_v18  ;;  %v3064_v18 = vld [vmem:[%s4046_s4 + $0x10] sm:$0xff]  }
  0x3b   : > { %634 = vmatprep.subr.bf16.mxu1 %v3252_v0  ;;  %2754 = vmatpush3.bf16.msra.mxu0 %v3064_v18 }
  0x3e   : > { %635 = vmatpush1.bf16.msra.mxu1 %v3035_v19  ;;  %v3065_v19 = vld [vmem:[%s4046_s4 + $0x110] sm:$0xff]  }
  0x3f   : > { %636 = vmatprep.subr.bf16.mxu1 %v3252_v0 }
  0x42   : > { %637 = vmatpush1.bf16.msra.mxu1 %v3036_v20  ;;  %v3066_v20 = vld [vmem:[%s4046_s4 + $0x48] sm:$0xff]  }
  0x43   : > { %644 = vmatprep.subr.bf16.mxu1 %v3252_v0  ;;  %2755 = vmatprep.subr.bf16.mxu0 %v3066_v20  ;;  %v3076_v20 = vld [vmem:[%s4046_s4 + $0xb8] sm:$0xff]  }
  0x46   : > { %645 = vmatpush2.bf16.msra.mxu1 %v620_v22  ;;  %v3068_v22 = vld [vmem:[%s4046_s4 + $0x8] sm:$0xff]  }
  0x47   : > { %646 = vmatprep.subr.bf16.mxu1 %v3252_v0  ;;  %2756 = vmatpush3.bf16.msra.mxu0 %v3068_v22  ;;  %v3077_v22 = vld [vmem:[%s4046_s4 + $0x238] sm:$0xff]  }
  0x4a   : > { %647 = vmatpush2.bf16.msra.mxu1 %v3038_v23  ;;  %v3069_v23 = vld [vmem:[%s4046_s4 + $0x108] sm:$0xff]  }
  0x4b   : > { %648 = vmatprep.subr.bf16.mxu1 %v3252_v0 }
  0x4e   : > { %649 = vmatpush2.bf16.msra.mxu1 %v3039_v24  ;;  %v3070_v24 = vld [vmem:[%s4046_s4 + $0x40] sm:$0xff]  }
  0x4f   : > { %650 = vmatprep.subr.bf16.mxu1 %v3252_v0  ;;  %2757 = vmatprep.subr.bf16.mxu0 %v3070_v24  ;;  %v3079_v24 = vld [vmem:[%s4046_s4 + $0x270] sm:$0xff]  }
  0x52   : > { %651 = vmatpush2.bf16.msra.mxu1 %v3040_v25  ;;  %v3071_v25 = vld [vmem:[%s4046_s4 + $0x140] sm:$0xff]  }
  0x53   : > { %652 = vmatprep.subr.bf16.mxu1 %v3252_v0  ;;  %v3045_v0 = vld [vmem:[%s4046_s4 + $0x138] sm:$0xff]  }
  0x56   : > { %653 = vmatpush2.bf16.msra.mxu1 %v3041_v26  ;;  %v3072_v26 = vld [vmem:[%s4046_s4] sm:$0xff]  }
  0x57   : > { %2787 = vmatprep.subr.bf16.mxu1 %v3043_v28  ;;  %2758 = vmatpush3.bf16.msra.mxu0 %v3072_v26  ;;  %v3074_v28 = vld [vmem:[%s4046_s4 + $0xf8] sm:$0xff]  }
  0x58   : > { %2765 = vmatprep.subr.bf16.mxu0 %v3074_v28 }
  0x93   : > { %v405_v33 = vpop.permute.xlu0 %404 }
  0x97   : > { %v410_v39 = vpop.permute.xlu0 %409 }
  0xe5   : > { %v483_v34 = vpop.f32.mrf.mxu1 }
  0xe6   : > { %v484_v35 = vadd.f32 %v483_v34, %v405_v33  ;;  %v3542_v34 = vshrl.u32 %v665_v30, 7 }
  0xe7   : > { %v485_v36 = vpop.f32.mrf.mxu1 }
  0xe8   : > { %v492_v37 = vadd.f32 3.0, %v484_v35  ;;  %v486_v38 = vadd.f32 %v485_v36, %v405_v33  ;;  %v673_v33 = vunpack.c.0.s8 %v672_v32  ;;  %v805_v5 = vsub.s32 0, %v3542_v34  ;;  %v3082_v36 = vld [vmem:[%s4046_s4 + $0xe8] sm:$0xff]  }
  0xe9   : > { %v487_v40 = vpop.f32.mrf.mxu1  ;;  %v817_v8 = vsub.s32 3, %v3542_v34  ;;  %v813_v26 = vsub.s32 2, %v3542_v34  ;;  %v833_v32 = vsub.s32 7, %v3542_v34 }
  0xea   : > { %v493_v41 = vadd.f32 3.0, %v486_v38  ;;  %v488_v42 = vadd.f32 %v487_v40, %v410_v39  ;;  %v496_v43 = vmax.f32 %v492_v37, 0.0 }
  0xeb   : > { %v489_v44 = vpop.f32.mrf.mxu1 }
  0xec   : > { %v497_v45 = vmax.f32 %v493_v41, 0.0  ;;  %v494_v46 = vadd.f32 3.0, %v488_v42  ;;  %v490_v47 = vadd.f32 %v489_v44, %v410_v39  ;;  %v500_v51 = vmin.f32 %v496_v43, 6.0 }
  0xee   : > { %v501_v48 = vmin.f32 %v497_v45, 6.0  ;;  %v498_v49 = vmax.f32 %v494_v46, 0.0  ;;  %v495_v50 = vadd.f32 3.0, %v490_v47  ;;  %v504_v57 = vmul.f32 %v500_v51, %v484_v35 }
  0xef   : > { %v676_v35 = vsub.s32 %v673_v33, %v3542_v34 }
  0xf0   : > { %v502_v52 = vmin.f32 %v498_v49, 6.0  ;;  %v499_v53 = vmax.f32 %v495_v50, 0.0  ;;  %v505_v54 = vmul.f32 %v501_v48, %v486_v38  ;;  %v508_v62 = vmul.f32 0.16666667, %v504_v57 }
  0xf2   : > { %v506_v55 = vmul.f32 %v502_v52, %v488_v42  ;;  %v503_v56 = vmin.f32 %v499_v53, 6.0  ;;  %v509_v60 = vmul.f32 0.16666667, %v505_v54 }
  0xf4   : > { %v507_v58 = vmul.f32 %v503_v56, %v490_v47  ;;  %v510_v59 = vmul.f32 0.16666667, %v506_v55 }
  0xf6   : > { %v511_v61 = vmul.f32 0.16666667, %v507_v58  ;;  %v512_v1 = vpack.c.bf16 %v510_v59, %v508_v62 }
  0xf8   : > { %v513_v63 = vpack.c.bf16 %v511_v61, %v509_v60 }
  0xfa   : > { %2594 = vmatprep.mubr.msk.bf16.mxu1 %vm614_vm4, %v513_v63 }
  0xfb   : > { %655 = vmatmul.mubr.bf16.vlgmr.msra.gmra.mxu1 %v512_v1 }
  0xfc   : > { %2788 = vmatpush3.bf16.msra.mxu1 %v3045_v0 }
  0xfd   : > { %2789 = vmatprep.subr.bf16.mxu1 %v3047_v2 }
 0x100   : > { %2790 = vmatpush3.bf16.msra.mxu1 %v3049_v3  ;;  %v809_v3 = vsub.s32 1, %v3542_v34 }
 0x101   : > { %2791 = vmatprep.subr.bf16.mxu1 %v3051_v4  ;;  %v825_v4 = vsub.s32 5, %v3542_v34 }
 0x104   : > { %2792 = vmatpush3.bf16.msra.mxu1 %v3053_v6  ;;  %v821_v6 = vsub.s32 4, %v3542_v34 }
 0x105   : > { %2793 = vmatprep.subr.bf16.mxu1 %v3055_v9  ;;  %v829_v9 = vsub.s32 6, %v3542_v34 }
 0x108   : > { %2794 = vmatpush3.bf16.msra.mxu1 %v3057_v11 }
 0x109   : > { %2795 = vmatprep.subr.bf16.mxu1 %v3059_v13 }
 0x10c   : > { %2796 = vmatpush3.bf16.msra.mxu1 %v3061_v15 }
 0x10d   : > { %2797 = vmatprep.subr.bf16.mxu1 %v3063_v17 }
 0x110   : > { %2798 = vmatpush3.bf16.msra.mxu1 %v3065_v19 }
 0x111   : > { %2799 = vmatprep.subr.bf16.mxu1 %v3067_v21 }
 0x114   : > { %2800 = vmatpush3.bf16.msra.mxu1 %v3069_v23  ;;  %v3078_v23 = vld [vmem:[%s4046_s4 + $0xf0] sm:$0xff]  }
 0x115   : > { %2801 = vmatprep.subr.bf16.mxu1 %v3071_v25 }
 0x118   : > { %2802 = vmatpush3.bf16.msra.mxu1 %v3073_v27 }
 0x119   : > { %2831 = vmatprep.subr.bf16.mxu1 %v3075_v29  ;;  %v3080_v29 = vld [vmem:[%s4046_s4 + $0xb0] sm:$0xff]  }
 0x1bb   : > { %v656_v37 = vpop.f32.mrf.mxu1 }
 0x1bc   : > { %669 = vst.msk [vmem:[#allocation2] sm:$0x1] %vm3546_vm5, %v656_v37  ;;  %v677_v38 = vrot.slane %v656_v37, %v676_v35  ;;  %v701_v39 = vcombine.high %v656_v37, %v656_v37  ;;  %v3083_v37 = vld [vmem:[%s4046_s4 + $0x268] sm:$0xff]  }
 0x1bd   : > { %v658_v40 = vpop.f32.mrf.mxu1 }
 0x1be   : > { %v678_v41 = vcombine.high %v677_v38, %v677_v38  ;;  %v685_v42 = vrot.slane %v677_v38, %v676_v35  ;;  %v708_v43 = vrot.slane %v701_v39, %v676_v35  ;;  %v3084_v40 = vld [vmem:[%s4046_s4 + $0xa8] sm:$0xff]  }
 0x1bf   : > { %v659_v44 = vpop.f32.mrf.mxu1 }
 0x1c0   : > { %v692_v45 = vrot.slane %v678_v41, %v676_v35  ;;  %v695_v46 = vcombine.high %v685_v42, %v685_v42  ;;  %v715_v47 = vrot.slane %v708_v43, %v676_v35  ;;  %v718_v48 = vcombine.high %v708_v43, %v708_v43  ;;  %734 = vst.msk [vmem:[#allocation2 + $0x8] sm:$0x1] %vm3546_vm5, %v659_v44  ;;  %v3085_v41 = vld [vmem:[%s4046_s4 + $0x228] sm:$0xff]   ;;  %v3086_v42 = vld [vmem:[%s4046_s4 + $0xe0] sm:$0xff]  }
 0x1c1   : > { %v742_v49 = vrot.slane %v659_v44, %v676_v35  ;;  %v766_v50 = vcombine.high %v659_v44, %v659_v44  ;;  %v661_v51 = vpop.f32.mrf.mxu1  ;;  %v3087_v43 = vld [vmem:[%s4046_s4 + $0x260] sm:$0xff]  }
 0x1c2   : > { %694 = vst.msk [vmem:[#allocation2 + $0x1] sm:$0x1] %vm3546_vm5, %v692_v45  ;;  %697 = vst.msk [vmem:[#allocation2 + $0x2] sm:$0x1] %vm3546_vm5, %v695_v46  ;;  %v698_v52 = vcombine.high %v692_v45, %v692_v45  ;;  %v725_v53 = vrot.slane %v718_v48, %v676_v35  ;;  %v728_v54 = vcombine.high %v715_v47, %v715_v47  ;;  %v3088_v44 = vld [vmem:[%s4046_s4 + $0xa0] sm:$0xff]   ;;  %v3090_v46 = vld [vmem:[%s4046_s4 + $0xd8] sm:$0xff]  }
 0x1c3   : > { %717 = vst.msk [vmem:[#allocation2 + $0x4] sm:$0x1] %vm3546_vm5, %v715_v47  ;;  %v743_v55 = vcombine.high %v742_v49, %v742_v49  ;;  %v750_v56 = vrot.slane %v742_v49, %v676_v35  ;;  %v773_v57 = vrot.slane %v766_v50, %v676_v35  ;;  %v3089_v45 = vld [vmem:[%s4046_s4 + $0x220] sm:$0xff]   ;;  %v3091_v47 = vld [vmem:[%s4046_s4 + $0x258] sm:$0xff]   ;;  %v3094_v50 = vld [vmem:[%s4046_s4 + $0xd0] sm:$0xff]  }
 0x1c4   : > { %700 = vst.msk [vmem:[#allocation2 + $0x3] sm:$0x1] %vm3546_vm5, %v698_v52  ;;  %727 = vst.msk [vmem:[#allocation2 + $0x5] sm:$0x1] %vm3546_vm5, %v725_v53  ;;  %v731_v58 = vcombine.high %v725_v53, %v725_v53  ;;  %v3092_v48 = vld [vmem:[%s4046_s4 + $0x98] sm:$0xff]   ;;  %v3095_v51 = vld [vmem:[%s4046_s4 + $0x250] sm:$0xff]  }
 0x1c5   : > { %730 = vst.msk [vmem:[#allocation2 + $0x6] sm:$0x1] %vm3546_vm5, %v728_v54  ;;  %v757_v59 = vrot.slane %v743_v55, %v676_v35  ;;  %v760_v60 = vcombine.high %v750_v56, %v750_v56  ;;  %v780_v61 = vrot.slane %v773_v57, %v676_v35  ;;  %v783_v62 = vcombine.high %v773_v57, %v773_v57  ;;  %v3093_v49 = vld [vmem:[%s4046_s4 + $0x218] sm:$0xff]   ;;  %v3096_v52 = vld [vmem:[%s4046_s4 + $0x90] sm:$0xff]   ;;  %v3098_v54 = vld [vmem:[%s4046_s4 + $0xc8] sm:$0xff]  }
 0x1c6   : > { %733 = vst.msk [vmem:[#allocation2 + $0x7] sm:$0x1] %vm3546_vm5, %v731_v58  ;;  %v3097_v53 = vld [vmem:[%s4046_s4 + $0x210] sm:$0xff]   ;;  %v3099_v55 = vld [vmem:[%s4046_s4 + $0x248] sm:$0xff]   ;;  %v3102_v58 = vld [vmem:[%s4046_s4 + $0xc0] sm:$0xff]  }
 0x1c7   : > { %759 = vst.msk [vmem:[#allocation2 + $0x9] sm:$0x1] %vm3546_vm5, %v757_v59  ;;  %762 = vst.msk [vmem:[#allocation2 + $0xa] sm:$0x1] %vm3546_vm5, %v760_v60  ;;  %v763_v63 = vcombine.high %v757_v59, %v757_v59  ;;  %v790_v0 = vrot.slane %v783_v62, %v676_v35  ;;  %v793_v1 = vcombine.high %v780_v61, %v780_v61  ;;  %v3100_v56 = vld [vmem:[%s4046_s4 + $0x88] sm:$0xff]   ;;  %v3103_v59 = vld [vmem:[%s4046_s4 + $0x240] sm:$0xff]  }
 0x1c8   : > { %782 = vst.msk [vmem:[#allocation2 + $0xc] sm:$0x1] %vm3546_vm5, %v780_v61  ;;  %v3101_v57 = vld [vmem:[%s4046_s4 + $0x208] sm:$0xff]   ;;  %v3104_v60 = vld [vmem:[%s4046_s4 + $0x80] sm:$0xff]  }
 0x1c9   : > { %765 = vst.msk [vmem:[#allocation2 + $0xb] sm:$0x1] %vm3546_vm5, %v763_v63  ;;  %792 = vst.msk [vmem:[#allocation2 + $0xd] sm:$0x1] %vm3546_vm5, %v790_v0  ;;  %v796_v2 = vcombine.high %v790_v0, %v790_v0  ;;  %v3105_v61 = vld [vmem:[%s4046_s4 + $0x200] sm:$0xff]   ;;  %v3106_v63 = vld [vmem:[%s4046_s4 + $0x1f8] sm:$0xff]  }
 0x1ca   : > { %795 = vst.msk [vmem:[#allocation2 + $0xe] sm:$0x1] %vm3546_vm5, %v793_v1  ;;  %v3107_v1 = vld [vmem:[%s4046_s4 + $0x378] sm:$0xff]  }
 0x1cb   : > { %798 = vst.msk [vmem:[#allocation2 + $0xf] sm:$0x1] %vm3546_vm5, %v796_v2 }
 0x1cd   : > { %v3588_v10 = vld [vmem:[#allocation2] sm:$0xff] }
 0x1ce   : > { %v810_v11 = vrot.slane %v3588_v10, %v809_v3  ;;  %v826_v12 = vrot.slane %v3588_v10, %v825_v4  ;;  %v806_v13 = vrot.slane %v3588_v10, %v805_v5  ;;  %v822_v14 = vrot.slane %v3588_v10, %v821_v6 }
 0x1cf   : > { %v818_v15 = vrot.slane %v3588_v10, %v817_v8  ;;  %v3604_v16 = vrot.slane %v3588_v10, %v829_v9  ;;  %v814_v62 = vrot.slane %v3588_v10, %v813_v26  ;;  %v834_v2 = vrot.slane %v3588_v10, %v833_v32  ;;  %v3110_v10 = vld [vmem:[%s4046_s4 + $0x1f0] sm:$0xff]  }
 0x1d0   : > { %v884_v17 = vpack.c.bf16 %v810_v11, %v810_v11  ;;  %v888_v18 = vpack.c.bf16 %v826_v12, %v826_v12  ;;  %v883_v19 = vpack.c.bf16 %v806_v13, %v806_v13  ;;  %v887_v21 = vpack.c.bf16 %v822_v14, %v822_v14 }
 0x1d1   : > { %v886_v27 = vpack.c.bf16 %v818_v15, %v818_v15  ;;  %v885_v11 = vpack.c.bf16 %v814_v62, %v814_v62  ;;  %v890_v13 = vpack.c.bf16 %v834_v2, %v834_v2  ;;  %v3112_v15 = vld [vmem:[%s4046_s4 + $0x1b0] sm:$0xff]   ;;  %v3152_v62 = vld [vmem:[%s4046_s4 + $0x2c0] sm:$0xff]  }
 0x1d2   : > { %1956 = vmatprep.mubr.bf16.mxu0 %v884_v17  ;;  %2036 = vmatprep.mubr.bf16.mxu1 %v888_v18  ;;  %v3618_v25 = vld [vmem:[#allocation2 + $0x8] sm:$0xff]  ;;  %v3113_v17 = vld [vmem:[%s4046_s4 + $0x330] sm:$0xff]  }
 0x1d3   : > { %1957 = vmatmul.mubr.bf16.vlgmr.msra.gmra.mxu0 %v883_v19  ;;  %2037 = vmatmul.mubr.bf16.vlgmr.msra.gmra.mxu1 %v887_v21  ;;  %v842_v28 = vrot.slane %v3618_v25, %v809_v3  ;;  %v3632_v33 = vrot.slane %v3618_v25, %v813_v26  ;;  %v3641_v38 = vrot.slane %v3618_v25, %v833_v32  ;;  %v3114_v18 = vld [vmem:[%s4046_s4 + $0x1e8] sm:$0xff]   ;;  %v3121_v26 = vld [vmem:[%s4046_s4 + $0x320] sm:$0xff]   ;;  %v3126_v32 = vld [vmem:[%s4046_s4 + $0x1d0] sm:$0xff]  }
 0x1d4   : > { %2766 = vmatpush3.bf16.msra.mxu0 %v3076_v20  ;;  %2832 = vmatpush3.bf16.msra.mxu1 %v3077_v22  ;;  %v3644_v39 = vrot.slane %v3618_v25, %v829_v9  ;;  %v838_v0 = vrot.slane %v3618_v25, %v805_v5  ;;  %v858_v3 = vrot.slane %v3618_v25, %v825_v4  ;;  %v3108_v9 = vld [vmem:[%s4046_s4 + $0x1b8] sm:$0xff]   ;;  %v3111_v4 = vld [vmem:[%s4046_s4 + $0x370] sm:$0xff]   ;;  %v3115_v19 = vld [vmem:[%s4046_s4 + $0x368] sm:$0xff]  }
 0x1d5   : > { %1996 = vmatprep.mubr.bf16.mxu0 %v886_v27  ;;  %2767 = vmatprep.subr.bf16.mxu0 %v3078_v23  ;;  %v892_v35 = vpack.c.bf16 %v842_v28, %v842_v28  ;;  %v3109_v5 = vld [vmem:[%s4046_s4 + $0x338] sm:$0xff]   ;;  %v3116_v20 = vld [vmem:[%s4046_s4 + $0x1a8] sm:$0xff]   ;;  %v3118_v22 = vld [vmem:[%s4046_s4 + $0x1e0] sm:$0xff]   ;;  %v893_v2 = vpack.c.bf16 %v3632_v33, %v3632_v33 }
 0x1d6   : > { %2833 = vmatprep.subr.bf16.mxu1 %v3079_v24  ;;  %v891_v12 = vpack.c.bf16 %v838_v0, %v838_v0  ;;  %v896_v14 = vpack.c.bf16 %v858_v3, %v858_v3  ;;  %v3117_v21 = vld [vmem:[%s4046_s4 + $0x328] sm:$0xff]   ;;  %v3119_v23 = vld [vmem:[%s4046_s4 + $0x360] sm:$0xff]   ;;  %v3122_v27 = vld [vmem:[%s4046_s4 + $0x1d8] sm:$0xff]  }
 0x1d7   : > { %2116 = vmatprep.mubr.bf16.mxu1 %v892_v35  ;;  %v3120_v24 = vld [vmem:[%s4046_s4 + $0x1a0] sm:$0xff]   ;;  %v3123_v28 = vld [vmem:[%s4046_s4 + $0x358] sm:$0xff]   ;;  %v3127_v35 = vld [vmem:[%s4046_s4 + $0x350] sm:$0xff]  }
 0x1d8   : > { %2768 = vmatpush3.bf16.msra.mxu0 %v3080_v29  ;;  %2834 = vmatpush3.bf16.msra.mxu1 %v3081_v31  ;;  %v3124_v29 = vld [vmem:[%s4046_s4 + $0x198] sm:$0xff]   ;;  %v3156_v3 = vld [vmem:[%s4046_s4 + $0x3f0] sm:$0xff]   ;;  %v3158_v33 = vld [vmem:[%s4046_s4 + $0x3e8] sm:$0xff]  }
 0x1d9   : > { %2769 = vmatprep.subr.bf16.mxu0 %v3082_v36  ;;  %2835 = vmatprep.subr.bf16.mxu1 %v3083_v37  ;;  %v3125_v31 = vld [vmem:[%s4046_s4 + $0x318] sm:$0xff]   ;;  %v3128_v36 = vld [vmem:[%s4046_s4 + $0x190] sm:$0xff]  }
 0x1da   : > { %v3129_v37 = vld [vmem:[%s4046_s4 + $0x310] sm:$0xff]   ;;  %v3154_v0 = vld [vmem:[%s4046_s4 + $0x3f8] sm:$0xff]  }
 0x1dc   : > { %2770 = vmatpush3.bf16.msra.mxu0 %v3084_v40  ;;  %2836 = vmatpush3.bf16.msra.mxu1 %v3085_v41  ;;  %v3130_v40 = vld [vmem:[%s4046_s4 + $0x1c8] sm:$0xff]  }
 0x1dd   : > { %2771 = vmatprep.subr.bf16.mxu0 %v3086_v42  ;;  %2837 = vmatprep.subr.bf16.mxu1 %v3087_v43  ;;  %v3131_v41 = vld [vmem:[%s4046_s4 + $0x348] sm:$0xff]  }
 0x1de   : > { %v3132_v42 = vld [vmem:[%s4046_s4 + $0x188] sm:$0xff]  }
 0x1df   : > { %v3133_v43 = vld [vmem:[%s4046_s4 + $0x308] sm:$0xff]  }
 0x1e0   : > { %2772 = vmatpush3.bf16.msra.mxu0 %v3088_v44  ;;  %2838 = vmatpush3.bf16.msra.mxu1 %v3089_v45  ;;  %v3134_v44 = vld [vmem:[%s4046_s4 + $0x1c0] sm:$0xff]  }
 0x1e1   : > { %2773 = vmatprep.subr.bf16.mxu0 %v3090_v46  ;;  %2839 = vmatprep.subr.bf16.mxu1 %v3091_v47  ;;  %v3135_v45 = vld [vmem:[%s4046_s4 + $0x340] sm:$0xff]  }
 0x1e2   : > { %v3136_v46 = vld [vmem:[%s4046_s4 + $0x180] sm:$0xff]  }
 0x1e3   : > { %v3137_v47 = vld [vmem:[%s4046_s4 + $0x300] sm:$0xff]  }
 0x1e4   : > { %2774 = vmatpush3.bf16.msra.mxu0 %v3092_v48  ;;  %2840 = vmatpush3.bf16.msra.mxu1 %v3093_v49  ;;  %v3138_v48 = vld [vmem:[%s4046_s4 + $0x2f8] sm:$0xff]   ;;  %v854_v49 = vrot.slane %v3618_v25, %v821_v6  ;;  %v3141_v6 = vld [vmem:[%s4046_s4 + $0x2b0] sm:$0xff]  }
 0x1e5   : > { %2775 = vmatprep.subr.bf16.mxu0 %v3094_v50  ;;  %2841 = vmatprep.subr.bf16.mxu1 %v3095_v51  ;;  %v850_v50 = vrot.slane %v3618_v25, %v817_v8  ;;  %v3139_v51 = vld [vmem:[%s4046_s4 + $0x2b8] sm:$0xff]   ;;  %v3142_v8 = vld [vmem:[%s4046_s4 + $0x2e8] sm:$0xff]   ;;  %v3144_v25 = vld [vmem:[%s4046_s4 + $0x2e0] sm:$0xff]  }
 0x1e7   : > { %v894_v34 = vpack.c.bf16 %v850_v50, %v850_v50  ;;  %v1155_v50 = vld [vmem:[%s4047_s5] sm:$0x1] }
 0x1e8   : > { %2776 = vmatpush3.bf16.msra.mxu0 %v3096_v52  ;;  %2842 = vmatpush3.bf16.msra.mxu1 %v3097_v53  ;;  %v889_v52 = vpack.c.bf16 %v3604_v16, %v3604_v16  ;;  %v3140_v53 = vld [vmem:[%s4046_s4 + $0x2f0] sm:$0xff]   ;;  %v3143_v16 = vld [vmem:[%s4046_s4 + $0x2a8] sm:$0xff]  }
 0x1e9   : > { %2777 = vmatprep.subr.bf16.mxu0 %v3098_v54  ;;  %2843 = vmatprep.subr.bf16.mxu1 %v3099_v55  ;;  %v895_v54 = vpack.c.bf16 %v854_v49, %v854_v49  ;;  %v3145_v55 = vld [vmem:[%s4046_s4 + $0x2a0] sm:$0xff]   ;;  %v3183_v49 = vld [vmem:[%s4050_s8 + $0x10] sm:$0xff]  }
 0x1ec   : > { %2778 = vmatpush3.bf16.msra.mxu0 %v3100_v56  ;;  %2844 = vmatpush3.bf16.msra.mxu1 %v3101_v57  ;;  %v3146_v56 = vld [vmem:[%s4046_s4 + $0x2d8] sm:$0xff]  }
 0x1ed   : > { %2779 = vmatprep.subr.bf16.mxu0 %v3102_v58  ;;  %2845 = vmatprep.subr.bf16.mxu1 %v3103_v59  ;;  %v3147_v57 = vld [vmem:[%s4046_s4 + $0x298] sm:$0xff]   ;;  %v3148_v58 = vld [vmem:[%s4046_s4 + $0x2d0] sm:$0xff]  }
 0x1ee   : > { %v3149_v59 = vld [vmem:[%s4046_s4 + $0x290] sm:$0xff]  }
 0x1f0   : > { %2780 = vmatpush3.bf16.msra.mxu0 %v3104_v60  ;;  %2846 = vmatpush3.bf16.msra.mxu1 %v3105_v61  ;;  %v3150_v60 = vld [vmem:[%s4046_s4 + $0x2c8] sm:$0xff]  }
 0x1f1   : > { %2809 = vmatprep.subr.bf16.mxu0 %v3106_v63  ;;  %2875 = vmatprep.subr.bf16.mxu1 %v3107_v1  ;;  %v3151_v61 = vld [vmem:[%s4046_s4 + $0x288] sm:$0xff]   ;;  %v3153_v63 = vld [vmem:[%s4046_s4 + $0x280] sm:$0xff]   ;;  %v3155_v1 = vld [vmem:[%s4046_s4 + $0x3b8] sm:$0xff]  }
 0x1f3   : > { %1997 = vmatmul.mubr.bf16.vlgmr.msra.gmra.mxu0 %v885_v11  ;;  %2117 = vmatmul.mubr.bf16.vlgmr.msra.gmra.mxu1 %v891_v12  ;;  %v3157_v11 = vld [vmem:[%s4046_s4 + $0x3b0] sm:$0xff]   ;;  %v3159_v12 = vld [vmem:[%s4046_s4 + $0x3a8] sm:$0xff]  }
 0x1f4   : > { %2810 = vmatpush3.bf16.msra.mxu0 %v3108_v9  ;;  %2076 = vmatprep.mubr.bf16.mxu0 %v890_v13  ;;  %v898_v9 = vpack.c.bf16 %v3641_v38, %v3641_v38  ;;  %v3160_v38 = vld [vmem:[%s4046_s4 + $0x3e0] sm:$0xff]   ;;  %v3162_v13 = vld [vmem:[%s4046_s4 + $0x3d8] sm:$0xff]  }
 0x1f5   : > { %2876 = vmatpush3.bf16.msra.mxu1 %v3109_v5  ;;  %2196 = vmatprep.mubr.bf16.mxu1 %v896_v14  ;;  %v3161_v5 = vld [vmem:[%s4046_s4 + $0x3a0] sm:$0xff]   ;;  %v3165_v14 = vld [vmem:[%s4046_s4 + $0x390] sm:$0xff]  }
 0x1f6   : > { %2811 = vmatprep.subr.bf16.mxu0 %v3110_v10  ;;  %2877 = vmatprep.subr.bf16.mxu1 %v3111_v4  ;;  %v3163_v10 = vld [vmem:[%s4046_s4 + $0x398] sm:$0xff]   ;;  %v3164_v4 = vld [vmem:[%s4046_s4 + $0x3d0] sm:$0xff]  }
 0x1f8   : > { %2812 = vmatpush3.bf16.msra.mxu0 %v3112_v15  ;;  %v3166_v15 = vld [vmem:[%s4046_s4 + $0x3c8] sm:$0xff]  }
 0x1f9   : > { %2878 = vmatpush3.bf16.msra.mxu1 %v3113_v17  ;;  %2813 = vmatprep.subr.bf16.mxu0 %v3114_v18  ;;  %v3167_v17 = vld [vmem:[%s4046_s4 + $0x388] sm:$0xff]   ;;  %v3168_v18 = vld [vmem:[%s4046_s4 + $0x3c0] sm:$0xff]  }
 0x1fa   : > { %2879 = vmatprep.subr.bf16.mxu1 %v3115_v19  ;;  %v3169_v19 = vld [vmem:[%s4046_s4 + $0x380] sm:$0xff]  }
 0x1fc   : > { %2814 = vmatpush3.bf16.msra.mxu0 %v3116_v20  ;;  %v897_v20 = vpack.c.bf16 %v3644_v39, %v3644_v39  ;;  %v3173_v39 = vld [vmem:[%s4048_s6 + $0x20] sm:$0xff]  }
 0x1fd   : > { %2880 = vmatpush3.bf16.msra.mxu1 %v3117_v21  ;;  %2815 = vmatprep.subr.bf16.mxu0 %v3118_v22  ;;  %v3170_v21 = vld [vmem:[%s4048_s6 + $0x38] sm:$0xff]   ;;  %v3171_v22 = vld [vmem:[%s4048_s6 + $0x30] sm:$0xff]  }
 0x1fe   : > { %2881 = vmatprep.subr.bf16.mxu1 %v3119_v23  ;;  %v3172_v23 = vld [vmem:[%s4048_s6 + $0x28] sm:$0xff]  }
 0x200   : > { %2816 = vmatpush3.bf16.msra.mxu0 %v3120_v24  ;;  %v3174_v24 = vld [vmem:[%s4048_s6 + $0x18] sm:$0xff]  }
 0x201   : > { %2882 = vmatpush3.bf16.msra.mxu1 %v3121_v26  ;;  %2817 = vmatprep.subr.bf16.mxu0 %v3122_v27 }
 0x202   : > { %2883 = vmatprep.subr.bf16.mxu1 %v3123_v28  ;;  %v3175_v28 = vld [vmem:[%s4048_s6 + $0x10] sm:$0xff]  }
 0x204   : > { %2818 = vmatpush3.bf16.msra.mxu0 %v3124_v29 }
 0x205   : > { %2884 = vmatpush3.bf16.msra.mxu1 %v3125_v31  ;;  %2819 = vmatprep.subr.bf16.mxu0 %v3126_v32 }
 0x206   : > { %2885 = vmatprep.subr.bf16.mxu1 %v3127_v35 }
 0x208   : > { %2820 = vmatpush3.bf16.msra.mxu0 %v3128_v36 }
 0x209   : > { %2886 = vmatpush3.bf16.msra.mxu1 %v3129_v37  ;;  %2821 = vmatprep.subr.bf16.mxu0 %v3130_v40 }
 0x20a   : > { %2887 = vmatprep.subr.bf16.mxu1 %v3131_v41 }
 0x20c   : > { %2822 = vmatpush3.bf16.msra.mxu0 %v3132_v42  ;;  %v3176_v42 = vld [vmem:[%s4048_s6 + $0x8] sm:$0xff]  }
 0x20d   : > { %2888 = vmatpush3.bf16.msra.mxu1 %v3133_v43  ;;  %2823 = vmatprep.subr.bf16.mxu0 %v3134_v44  ;;  %v3177_v43 = vld [vmem:[%s4048_s6] sm:$0xff]   ;;  %v3178_v44 = vld [vmem:[%s4050_s8 + $0x38] sm:$0xff]  }
 0x20e   : > { %2889 = vmatprep.subr.bf16.mxu1 %v3135_v45  ;;  %v3179_v45 = vld [vmem:[%s4050_s8 + $0x30] sm:$0xff]  }
 0x210   : > { %2824 = vmatpush3.bf16.msra.mxu0 %v3136_v46  ;;  %v3180_v46 = vld [vmem:[%s4050_s8 + $0x28] sm:$0xff]  }
 0x211   : > { %2890 = vmatpush3.bf16.msra.mxu1 %v3137_v47  ;;  %2853 = vmatprep.subr.bf16.mxu0 %v3138_v48  ;;  %v3181_v47 = vld [vmem:[%s4050_s8 + $0x20] sm:$0xff]   ;;  %v3182_v48 = vld [vmem:[%s4050_s8 + $0x18] sm:$0xff]  }
 0x212   : > { %2937 = vmatprep.subr.bf16.mxu1 %v3254_v7 }
 0x213   : > { %2077 = vmatmul.mubr.bf16.vlgmr.msra.gmra.mxu0 %v889_v52 }
 0x214   : > { %2197 = vmatmul.mubr.bf16.vlgmr.msra.gmra.mxu1 %v895_v54  ;;  %2854 = vmatpush3.bf16.msra.mxu0 %v3139_v51 }
 0x215   : > { %2156 = vmatprep.mubr.bf16.mxu0 %v894_v34  ;;  %2855 = vmatprep.subr.bf16.mxu0 %v3140_v53 }
 0x216   : > { %2938 = vmatpush3.bf16.msra.mxu1 %v3170_v21  ;;  %2953 = vmatprep.mubr.msk.bf16.mxu1 %vm3256_vm6, %v3254_v7 }
 0x217   : > { %2939 = vmatprep.subr.bf16.mxu1 %v3254_v7 }
 0x218   : > { %2856 = vmatpush3.bf16.msra.mxu0 %v3141_v6 }
 0x219   : > { %2857 = vmatprep.subr.bf16.mxu0 %v3142_v8 }
 0x21a   : > { %2940 = vmatpush3.bf16.msra.mxu1 %v3171_v22 }
 0x21b   : > { %2941 = vmatprep.subr.bf16.mxu1 %v3254_v7 }
 0x21c   : > { %2858 = vmatpush3.bf16.msra.mxu0 %v3143_v16 }
 0x21d   : > { %2859 = vmatprep.subr.bf16.mxu0 %v3144_v25 }
 0x21e   : > { %2942 = vmatpush3.bf16.msra.mxu1 %v3172_v23 }
 0x21f   : > { %2943 = vmatprep.subr.bf16.mxu1 %v3254_v7 }
 0x220   : > { %2860 = vmatpush3.bf16.msra.mxu0 %v3145_v55 }
 0x221   : > { %2861 = vmatprep.subr.bf16.mxu0 %v3146_v56 }
 0x222   : > { %2944 = vmatpush3.bf16.msra.mxu1 %v3173_v39  ;;  %v3184_v39 = vld [vmem:[%s4050_s8 + $0x8] sm:$0xff]  }
 0x223   : > { %2945 = vmatprep.subr.bf16.mxu1 %v3254_v7 }
 0x224   : > { %2862 = vmatpush3.bf16.msra.mxu0 %v3147_v57 }
 0x225   : > { %2863 = vmatprep.subr.bf16.mxu0 %v3148_v58 }
 0x226   : > { %2946 = vmatpush3.bf16.msra.mxu1 %v3174_v24  ;;  %v3185_v24 = vld [vmem:[%s4050_s8] sm:$0xff]  }
 0x227   : > { %2947 = vmatprep.subr.bf16.mxu1 %v3254_v7 }
 0x228   : > { %2864 = vmatpush3.bf16.msra.mxu0 %v3149_v59 }
 0x229   : > { %2865 = vmatprep.subr.bf16.mxu0 %v3150_v60 }
 0x22a   : > { %2948 = vmatpush3.bf16.msra.mxu1 %v3175_v28 }
 0x22b   : > { %2949 = vmatprep.subr.bf16.mxu1 %v3254_v7 }
 0x22c   : > { %2866 = vmatpush3.bf16.msra.mxu0 %v3151_v61 }
 0x22d   : > { %2867 = vmatprep.subr.bf16.mxu0 %v3152_v62 }
 0x22e   : > { %2950 = vmatpush3.bf16.msra.mxu1 %v3176_v42 }
 0x22f   : > { %2951 = vmatprep.subr.bf16.mxu1 %v3254_v7 }
 0x230   : > { %2868 = vmatpush3.bf16.msra.mxu0 %v3153_v63 }
 0x231   : > { %2897 = vmatprep.subr.bf16.mxu0 %v3154_v0 }
 0x232   : > { %2952 = vmatpush3.bf16.msra.mxu1 %v3177_v43 }
 0x233   : > { %2157 = vmatmul.mubr.bf16.vlgmr.msra.gmra.mxu0 %v893_v2 }
 0x234   : > { %2898 = vmatpush3.bf16.msra.mxu0 %v3155_v1  ;;  %2236 = vmatprep.mubr.bf16.mxu0 %v898_v9 }
 0x235   : > { %2899 = vmatprep.subr.bf16.mxu0 %v3156_v3 }
 0x238   : > { %2900 = vmatpush3.bf16.msra.mxu0 %v3157_v11 }
 0x239   : > { %2901 = vmatprep.subr.bf16.mxu0 %v3158_v33 }
 0x23c   : > { %2902 = vmatpush3.bf16.msra.mxu0 %v3159_v12 }
 0x23d   : > { %2903 = vmatprep.subr.bf16.mxu0 %v3160_v38 }
 0x240   : > { %2904 = vmatpush3.bf16.msra.mxu0 %v3161_v5 }
 0x241   : > { %2905 = vmatprep.subr.bf16.mxu0 %v3162_v13 }
 0x244   : > { %2906 = vmatpush3.bf16.msra.mxu0 %v3163_v10 }
 0x245   : > { %2907 = vmatprep.subr.bf16.mxu0 %v3164_v4 }
 0x248   : > { %2908 = vmatpush3.bf16.msra.mxu0 %v3165_v14 }
 0x249   : > { %2909 = vmatprep.subr.bf16.mxu0 %v3166_v15 }
 0x24c   : > { %2910 = vmatpush3.bf16.msra.mxu0 %v3167_v17 }
 0x24d   : > { %2911 = vmatprep.subr.bf16.mxu0 %v3168_v18 }
 0x250   : > { %2912 = vmatpush3.bf16.msra.mxu0 %v3169_v19 }
 0x251   : > { %2957 = vmatprep.subr.bf16.mxu0 %v3254_v7 }
 0x253   : > { %2237 = vmatmul.mubr.bf16.vlgmr.msra.gmra.mxu0 %v897_v20 }
 0x254   : > { %2973 = vmatprep.mubr.msk.bf16.mxu0 %vm3256_vm6, %v3254_v7  ;;  %2958 = vmatpush3.bf16.msra.mxu0 %v3178_v44 }
 0x255   : > { %2959 = vmatprep.subr.bf16.mxu0 %v3254_v7 }
 0x258   : > { %2960 = vmatpush3.bf16.msra.mxu0 %v3179_v45 }
 0x259   : > { %2961 = vmatprep.subr.bf16.mxu0 %v3254_v7 }
 0x25c   : > { %2962 = vmatpush3.bf16.msra.mxu0 %v3180_v46 }
 0x25d   : > { %2963 = vmatprep.subr.bf16.mxu0 %v3254_v7 }
 0x260   : > { %2964 = vmatpush3.bf16.msra.mxu0 %v3181_v47 }
 0x261   : > { %2965 = vmatprep.subr.bf16.mxu0 %v3254_v7 }
 0x264   : > { %2966 = vmatpush3.bf16.msra.mxu0 %v3182_v48 }
 0x265   : > { %2967 = vmatprep.subr.bf16.mxu0 %v3254_v7 }
 0x268   : > { %2968 = vmatpush3.bf16.msra.mxu0 %v3183_v49 }
 0x269   : > { %2969 = vmatprep.subr.bf16.mxu0 %v3254_v7 }
 0x26c   : > { %2970 = vmatpush3.bf16.msra.mxu0 %v3184_v39 }
 0x26d   : > { %2971 = vmatprep.subr.bf16.mxu0 %v3254_v7  ;;  %v2369_v7 = vld [vmem:[%s4051_s9] sm:$0x1] }
 0x270   : > { %2972 = vmatpush3.bf16.msra.mxu0 %v3185_v24 }
 0x293   : > { %v2759_v26 = vpop.f32.mrf.mxu0  ;;  %v2803_v27 = vpop.f32.mrf.mxu1 }
 0x295   : > { %v2760_v29 = vpop.f32.mrf.mxu0  ;;  %v2804_v31 = vpop.f32.mrf.mxu1 }
 0x296   : > { %v2761_v32 = vadd.f32 %v2760_v29, %v2759_v26  ;;  %v2805_v35 = vadd.f32 %v2804_v31, %v2803_v27  ;;  %v2262_v26 = vld [vmem:[%s4049_s7] sm:$0x1] }
 0x297   : > { %v2762_v36 = vpop.f32.mrf.mxu0  ;;  %v2806_v37 = vpop.f32.mrf.mxu1 }
 0x298   : > { %v1959_v34 = vadd.f32 %v2761_v32, %v1155_v50  ;;  %v2460_v37 = vand.u32 127, %v665_v30 }
 0x299   : > { %v2763_v40 = vpop.f32.mrf.mxu0  ;;  %v2807_v41 = vpop.f32.mrf.mxu1 }
 0x29a   : > { %vm2461_vm7 = vcmp.lt.s32.totalorder %v2460_v37, 5 }
 0x2b3   : > { %v2781_v51 = vpop.f32.mrf.mxu0  ;;  %v2847_v52 = vpop.f32.mrf.mxu1 }
 0x2b5   : > { %v2782_v53 = vpop.f32.mrf.mxu0  ;;  %v2848_v54 = vpop.f32.mrf.mxu1 }
 0x2b6   : > { %v2783_v6 = vadd.f32 %v2782_v53, %v2781_v51  ;;  %v2849_v8 = vadd.f32 %v2848_v54, %v2847_v52 }
 0x2b7   : > { %v2784_v16 = vpop.f32.mrf.mxu0  ;;  %v2850_v25 = vpop.f32.mrf.mxu1 }
 0x2b8   : > { %v1999_v55 = vadd.f32 %v2783_v6, %v1959_v34 }
 0x2b9   : > { %v2785_v56 = vpop.f32.mrf.mxu0  ;;  %v2851_v57 = vpop.f32.mrf.mxu1 }
 0x2ba   : > { %v2039_v58 = vadd.f32 %v2805_v35, %v1999_v55 }
 0x2d3   : > { %v2825_v59 = vpop.f32.mrf.mxu0 }
 0x2d4   : > { %v2891_v60 = vpop.f32.mrf.mxu1 }
 0x2d5   : > { %v2826_v61 = vpop.f32.mrf.mxu0 }
 0x2d6   : > { %v2827_v62 = vadd.f32 %v2826_v61, %v2825_v59  ;;  %v2892_v63 = vpop.f32.mrf.mxu1 }
 0x2d7   : > { %v2828_v0 = vpop.f32.mrf.mxu0  ;;  %v2893_v14 = vadd.f32 %v2892_v63, %v2891_v60 }
 0x2d8   : > { %v2079_v1 = vadd.f32 %v2827_v62, %v2039_v58  ;;  %v2894_v2 = vpop.f32.mrf.mxu1 }
 0x2d9   : > { %v2829_v3 = vpop.f32.mrf.mxu0 }
 0x2da   : > { %v2895_v9 = vpop.f32.mrf.mxu1  ;;  %v2119_v11 = vadd.f32 %v2849_v8, %v2079_v1 }
 0x2f3   : > { %v2869_v33 = vpop.f32.mrf.mxu0 }
 0x2f5   : > { %v2870_v12 = vpop.f32.mrf.mxu0 }
 0x2f6   : > { %v2871_v13 = vadd.f32 %v2870_v12, %v2869_v33 }
 0x2f7   : > { %v2872_v38 = vpop.f32.mrf.mxu0 }
 0x2f8   : > { %v2159_v10 = vadd.f32 %v2871_v13, %v2119_v11 }
 0x2f9   : > { %v2873_v5 = vpop.f32.mrf.mxu0 }
 0x2fa   : > { %v2199_v17 = vadd.f32 %v2893_v14, %v2159_v10 }
 0x313   : > { %v2913_v4 = vpop.f32.mrf.mxu0 }
 0x315   : > { %v2914_v15 = vpop.f32.mrf.mxu0 }
 0x316   : > { %v2915_v18 = vadd.f32 %v2914_v15, %v2913_v4 }
 0x317   : > { %v2916_v19 = vpop.f32.mrf.mxu0 }
 0x318   : > { %v2239_v20 = vadd.f32 %v2915_v18, %v2199_v17 }
 0x319   : > { %v2917_v21 = vpop.f32.mrf.mxu0 }
 0x31a   : > { %v2244_v22 = vmax.f32 %v2239_v20, 0.0 }
 0x31c   : > { %v2245_v23 = vpack.c.bf16 %v2244_v22, %v2244_v22 }
 0x31e   : > { %2954 = vmatmul.mubr.bf16.vlgmr.msra.gmra.mxu1 %v2245_v23 }
 0x3de   : > { %v2345_v27 = vpop.f32.mrf.mxu1 }
 0x3df   : > { %v2346_v28 = vadd.f32 %v2345_v27, %v2262_v26 }
 0x3e0   : > { %v2955_v29 = vpop.f32.mrf.mxu1 }
 0x3e1   : > { %v2351_v31 = vmax.f32 %v2346_v28, 0.0 }
 0x3e2   : > { %v2348_v32 = vpop.f32.mrf.mxu1 }
 0x3e3   : > { %v2352_v35 = vpack.c.bf16 %v2351_v31, %v2351_v31 }
 0x3e4   : > { %v2956_v36 = vpop.f32.mrf.mxu1 }
 0x3e5   : > { %2974 = vmatmul.mubr.bf16.vlgmr.msra.gmra.mxu0 %v2352_v35 }
 0x4a5   : > { %v2452_v40 = vpop.f32.mrf.mxu0 }
 0x4a6   : > { %v2453_v41 = vadd.f32 %v2452_v40, %v2369_v7 }
 0x4a7   : > { %v2975_v42 = vpop.f32.mrf.mxu0 }
 0x4a8   : > { %2458 = vst [vmem:[%s392_s16] sm:$0x1] %v2453_v41  ;;  %v2462_v43 = vsel %vm2461_vm7, %v2453_v41, -1e+30  ;;  %s3194_s16 = sshll.u32 %s3257_s15, 4  ;;  %s3195_s16 = int_to_ptr.vmem [resolvable:$false] %s3194_s16 }
 0x4a9   : > { %v2455_v44 = vpop.f32.mrf.mxu0  ;;  %v2464_v45 = vsel %vm2463_vm8, %v2462_v43, -inf  ;;  %s3196_s21 = scalar_lea.vmem %s3195_s16, 32  ;;  %p3197_p0 = scmp.lt.s32.totalorder %s2496_s25, %s3195_s16 }
 0x4aa   : > { %2465 = vmax.xlane.f32.xlu1 %v2464_v45  ;;  %p3198_p1 = scmp.lt.s32.totalorder %s3196_s21, %s3190_s13 }
 0x4ab   : > { %v2976_v30 = vpop.f32.mrf.mxu0 }
 0x4ac   : > { %p3199_p2 = por %p3198_p1, %p3197_p0 }
 0x4ae   : > { %p3200_p3 = pnand %p3199_p2, %p3193_p13 }
 0x533   : > { %v2466_v46 = vpop.xlane.xlu1 %2465 }
 0x534   : > { %v2467_v47 = vsub.f32 %v2462_v43, %v2466_v46 }
 0x536   : > { %v2468_v48 = vmul.f32 1.442695, %v2467_v47 }
 0x538   : > { %3186 = vpow2.f32 %v2468_v48 }
 0x545   : > { %v3187_v49 = vpop.eup %3186 }
 0x546   : > { %v2470_v50 = vsel %vm2463_vm8, %v3187_v49, 0.0 }
 0x547   : > { %2471 = vadd.xlane.f32.xlu1 %v2470_v50 }
 0x5d0   : > { %v2472_v51 = vpop.xlane.xlu1 %2471 }
 0x5d1   : > { %3188 = vrcp.f32 %v2472_v51 }
 0x5de   : > { %v3189_v52 = vpop.eup %3188 }
 0x5df   : > { %v2474_v53 = vmul.f32 %v3189_v52, %v3187_v49 }
 0x5e1   : > { %2475 = vst [vmem:[%s384_s24] sm:$0x1] %v2474_v53 }
 0x5e2   : > { %3203 = shalt.err (!%p3200_p3)
}
 0x5e3   : > { %s3204_s1 = scalar_lea.hbm %s2493_s0, 16  ;;  %s3208_s24 = scalar_lea.hbm %s4053_s11, 32 }
 0x5e4   : > { %p3205_p4 = scmp.ne.s32.totalorder %s2493_s0, %s3204_s1  ;;  %p3209_p9 = scmp.lt.s32.totalorder %s2493_s0, %s4053_s11 }
 0x5e5   : > { %p3210_p10 = scmp.lt.s32.totalorder %s3208_s24, %s3204_s1 }
 0x5e6   : > { %p3206_p7 = pnand %p3205_p4, %p3356_p5 }
 0x5e7   : > { %p3211_p11 = por %p3210_p10, %p3209_p9 }
 0x5e8   : > { %p3207_p8 = pneg %p3206_p7 }
 0x5ea   : > { %p3212_p12 = pnand %p3211_p11, %p3207_p8 }
 0x5ec   : > { %3215 = shalt.err (!%p3212_p12)
}
 0x5ed   : > { %2977 = dma.vmem_to_hbm [thread:$0]  (%p3356_p5), %s2496_s25, 16, %s2493_s0, %s2480_s14  }
 0x5ee PF: > { %p2983_p13 = scmp.ge.s32.totalorder %s3250_s20, 2  ;;  %s2513_s13 = sand.u32 1, %s3238_s17  }
 0x5ef   : > { %s2514_s15 = scalar_lea.sflag [#allocation4], %s2513_s13 }
 0x5f0   : > { %p2980_p0 = pnand %p2983_p13, %p3360_p6 }
 0x5f2   : > { %p2981_p1 = pneg %p2980_p0 }
 0x5f4   : > { %3233 = dma.done.wait (%p2981_p1), %s2514_s15, 16  }
 0x5f5   : > { %3235 = vsyncadd (%p2981_p1), %s2514_s15, 4294967280  ;;  %p22_p2 = scmp.ge.s32.totalorder %s3343_s23, 4   ;;  %s4062_s17 = smov %s3242_s18 }
 0x5f6   : > { %s4063_s18 = smov %s3246_s19  ;;  %s4064_s19 = smov %s3354_s26 }
 0x5f7   : > { %s4065_s20 = smov %s3343_s23  ;;  %24 = sbr.rel (!%p22_p2) target bundleno = 6 (0x6), region = 107 }
 0x5fc   :  { %2518 = vsyncpa [#allocation4], 1 }
 0x5fd   :  { %2520 = vsyncpa [#allocation4 + $0x1], 1 }

</bundles_post_ra>
